<compile_context>
chip_gen: v7x
topology: tpu7x:2x2x1
jax: 0.10.0
libtpu: 0.0.40
codegen_flags: <defaults>
</compile_context>

<pallas_src>
import jax
import jax.numpy as jnp
from jax.experimental import pallas as pl
from jax.experimental.pallas import tpu as pltpu

NUM_COND = 77 * 4          # 308
NUM_Z = 60
X_DATA = 385
X_DIM = X_DATA + NUM_COND  # 693
H_DIM = 200
ZC_DIM = NUM_Z + NUM_COND  # 368

# padded / packed widths
H_PAD = 256                # hidden 200 -> 256 (exact MXU tiles, 2 full vregs)
Z_PAD = 64                 # mu and logvar each occupy 64 lanes of the packed output
MUVAR_PAD = 2 * Z_PAD      # 128: [mu(0:60) | 0 | logvar(64:124) | 0] -- also the z width
RECON_PAD = 512            # recon logits padded 385 -> 512 lanes


def cvae_kernel(x_ref, eps_ref,
                w1_ref, b1_ref,
                w2_ref, b2_ref,
                w3z_ref, w3c_ref, b3_ref,
                w4_ref, b4_ref,
                muvar_ref, recon_ref):
    f32 = jnp.float32
    bf16 = jnp.bfloat16

    x = x_ref[...]                                                     # [TB, 693] bf16

    # ---- encode ----
    h1 = jnp.dot(x, w1_ref[...], preferred_element_type=f32) + b1_ref[...]
    h1 = jnp.maximum(h1, 0.0)                                          # [TB, 256] f32

    # fused fc21/fc22, packed: mu in lanes 0:64, logvar in lanes 64:128
    muvar = (jnp.dot(h1.astype(bf16), w2_ref[...], preferred_element_type=f32)
             + b2_ref[...])                                            # [TB, 128] f32
    muvar_ref[...] = muvar                                             # lane-dense store

    # ---- reparameterize (training semantics) ----
    # roll logvar (lanes 64:128) onto lanes 0:64 so it lines up with mu (XLU, cheap).
    logvar_al = pltpu.roll(muvar, Z_PAD, 1)
    # lanes 0:60: mu + eps*exp(0.5*logvar) = z; padded lanes: eps = 0 -> stay mu-pad (= 0);
    # lanes 64:128 carry logvar (eps = 0 there) but only hit zero rows of w3z below.
    z = muvar + eps_ref[...] * jnp.exp(0.5 * logvar_al)                # [TB, 128] f32

    # ---- decode: fc3(concat([z, cond])) as a split matmul; cond sliced from x in-kernel ----
    cond = x[:, X_DATA:]                                               # [TB, 308] bf16
    h3 = (jnp.dot(z.astype(bf16), w3z_ref[...], preferred_element_type=f32)
          + jnp.dot(cond, w3c_ref[...], preferred_element_type=f32)
          + b3_ref[...])
    h3 = jnp.maximum(h3, 0.0)                                          # [TB, 256] f32

    logits = (jnp.dot(h3.astype(bf16), w4_ref[...], preferred_element_type=f32)
              + b4_ref[...])                                           # [TB, 512] f32
    # sigmoid via tanh: single EUP op, mathematically exact
    recon_ref[...] = 0.5 * (1.0 + jnp.tanh(0.5 * logits))


def _prepare_padded_params(params):
    """PyTorch [out, in] weights -> transposed, zero-padded, bf16 kernel weights.

    All padding is zero rows/columns, so real output lanes are bit-identical to the
    unpadded computation (only the bf16 cast changes numerics).
    """
    f32 = jnp.float32
    bf16 = jnp.bfloat16

    # fc1: [693, 256]
    w1 = jnp.zeros((X_DIM, H_PAD), f32).at[:, :H_DIM].set(params["w1"].T)
    b1 = jnp.zeros((1, H_PAD), f32).at[0, :H_DIM].set(params["b1"])

    # fused fc21/fc22, packed into 128 lanes: mu cols 0:60, logvar cols 64:124
    w2 = jnp.zeros((H_PAD, MUVAR_PAD), f32)
    w2 = w2.at[:H_DIM, :NUM_Z].set(params["w21"].T)
    w2 = w2.at[:H_DIM, Z_PAD:Z_PAD + NUM_Z].set(params["w22"].T)
    b2 = jnp.zeros((1, MUVAR_PAD), f32)
    b2 = b2.at[0, :NUM_Z].set(params["b21"])
    b2 = b2.at[0, Z_PAD:Z_PAD + NUM_Z].set(params["b22"])

    # fc3 split: z part (rows padded 60 -> 128), cond part (308 rows)
    w3t = params["w3"].T.astype(f32)                                   # [368, 200]
    w3z = jnp.zeros((MUVAR_PAD, H_PAD), f32).at[:NUM_Z, :H_DIM].set(w3t[:NUM_Z])
    w3c = jnp.zeros((NUM_COND, H_PAD), f32).at[:, :H_DIM].set(w3t[NUM_Z:])
    b3 = jnp.zeros((1, H_PAD), f32).at[0, :H_DIM].set(params["b3"])

    # fc4: [256, 512]
    w4 = jnp.zeros((H_PAD, RECON_PAD), f32).at[:H_DIM, :X_DATA].set(params["w4"].T)
    b4 = jnp.zeros((1, RECON_PAD), f32).at[0, :X_DATA].set(params["b4"])

    # weights bf16 (f32 accumulation in kernel), biases stay f32
    return (w1.astype(bf16), b1, w2.astype(bf16), b2,
            w3z.astype(bf16), w3c.astype(bf16), b3, w4.astype(bf16), b4)


def cvae_forward(x, eps, params, *, tile_b=None):
    """x: [B, 693], eps: [B, 60], params: dict of PyTorch-layout ([out, in]) weights."""
    B = x.shape[0]

    if tile_b is None:
        # smallest grid that keeps tiles <= 512 rows; >= 2 tiles whenever B allows so both
        # v7x TensorCores get work under dimension_semantics=("parallel",).
        grid_b = 1 if B <= 8 else max(2, pl.cdiv(B, 512))
        tile_b = ((pl.cdiv(B, grid_b) + 7) // 8) * 8
    else:
        grid_b = pl.cdiv(B, tile_b)
    b_pad = grid_b * tile_b

    # host-side layout plumbing (free in XLA): bf16 x, eps zero-padded to 128 lanes
    x_k = x.astype(jnp.bfloat16)                                       # [B, 693]
    eps_p = jnp.zeros((B, MUVAR_PAD), jnp.float32).at[:, :NUM_Z].set(eps.astype(jnp.float32))
    if b_pad != B:
        pad = ((0, b_pad - B), (0, 0))
        x_k = jnp.pad(x_k, pad)
        eps_p = jnp.pad(eps_p, pad)

    weights = _prepare_padded_params(params)

    def act_spec(width):
        return pl.BlockSpec((tile_b, width), lambda i: (i, 0))

    def resident_spec(shape):
        # constant index_map -> weights stay resident in VMEM across the batch grid
        return pl.BlockSpec(shape, lambda i: (0, 0))

    in_specs = ([act_spec(X_DIM), act_spec(MUVAR_PAD)]
                + [resident_spec(w.shape) for w in weights])
    out_specs = (act_spec(MUVAR_PAD), act_spec(RECON_PAD))

    flops = 2 * b_pad * (X_DIM * H_PAD + H_PAD * MUVAR_PAD + MUVAR_PAD * H_PAD
                         + NUM_COND * H_PAD + H_PAD * RECON_PAD)
    transcendentals = b_pad * (MUVAR_PAD + RECON_PAD)
    bytes_accessed = (b_pad * (2 * X_DIM + 4 * MUVAR_PAD        # x (bf16) + eps (f32) in
                               + 4 * MUVAR_PAD + 4 * RECON_PAD)  # muvar + recon out (f32)
                      + sum(int(w.size) * w.dtype.itemsize for w in weights))

    muvar, recon = pl.pallas_call(
        cvae_kernel,
        out_shape=(
            jax.ShapeDtypeStruct((b_pad, MUVAR_PAD), jnp.float32),   # packed [mu | logvar]
            jax.ShapeDtypeStruct((b_pad, RECON_PAD), jnp.float32),   # padded recon
        ),
        grid=(grid_b,),
        in_specs=in_specs,
        out_specs=out_specs,
        compiler_params=pltpu.CompilerParams(
            dimension_semantics=("parallel",),
            vmem_limit_bytes=32 * 1024 * 1024),
        cost_estimate=pl.CostEstimate(flops=int(flops),
                                      transcendentals=int(transcendentals),
                                      bytes_accessed=int(bytes_accessed)),
    )(x_k, eps_p, *weights)

    recon = recon[:B, :X_DATA]
    mu = muvar[:B, :NUM_Z]
    logvar = muvar[:B, Z_PAD:Z_PAD + NUM_Z]
    return recon, mu, logvar


def init_params(key):
    """Deterministic synthetic parameters with PyTorch nn.Linear shapes ([out, in])."""
    ks = jax.random.split(key, 10)

    def lin(kw, kb, out_f, in_f):
        bound = 1.0 / jnp.sqrt(in_f)
        w = jax.random.uniform(kw, (out_f, in_f), jnp.float32, -bound, bound)
        b = jax.random.uniform(kb, (out_f,), jnp.float32, -bound, bound)
        return w, b

    p = {}
    p["w1"], p["b1"] = lin(ks[0], ks[1], H_DIM, X_DIM)        # fc1: 693 -> 200
    p["w21"], p["b21"] = lin(ks[2], ks[3], NUM_Z, H_DIM)      # fc21: 200 -> 60
    p["w22"], p["b22"] = lin(ks[4], ks[5], NUM_Z, H_DIM)      # fc22: 200 -> 60
    p["w3"], p["b3"] = lin(ks[6], ks[7], H_DIM, ZC_DIM)       # fc3: 368 -> 200
    p["w4"], p["b4"] = lin(ks[8], ks[9], X_DATA, H_DIM)       # fc4: 200 -> 385
    return p


def cvae_ref(x, eps, params):
    """Pure-JAX f32 reference mirroring the PyTorch forward (training mode)."""
    h1 = jax.nn.relu(x @ params["w1"].T + params["b1"])
    mu = h1 @ params["w21"].T + params["b21"]
    logvar = h1 @ params["w22"].T + params["b22"]
    z = mu + eps * jnp.exp(0.5 * logvar)
    zc = jnp.concatenate([z, x[:, X_DATA:]], axis=1)
    h3 = jax.nn.relu(zc @ params["w3"].T + params["b3"])
    recon = jax.nn.sigmoid(h3 @ params["w4"].T + params["b4"])
    return recon, mu, logvar


if __name__ == "__main__":
    key = jax.random.PRNGKey(0)
    k_param, k_x, k_eps = jax.random.split(key, 3)

    B = 16
    params = init_params(k_param)
    x = jax.random.uniform(k_x, (B, X_DIM), jnp.float32)      # [16, 693]
    eps = jax.random.normal(k_eps, (B, NUM_Z), jnp.float32)   # [16, 60]

    recon, mu, logvar = cvae_forward(x, eps, params)
    jax.block_until_ready((recon, mu, logvar))

    # check against the f32 reference; tolerance relaxed for bf16 weights/activations
    # (f32 accumulation), per the perf review.
    r_ref, mu_ref_v, lv_ref = cvae_ref(x, eps, params)
    assert recon.shape == (B, X_DATA) and mu.shape == (B, NUM_Z) and logvar.shape == (B, NUM_Z)
    assert jnp.allclose(recon, r_ref, atol=2e-2, rtol=2e-2)
    assert jnp.allclose(mu, mu_ref_v, atol=2e-2, rtol=2e-2)
    assert jnp.allclose(logvar, lv_ref, atol=2e-2, rtol=2e-2)

    print("KERNEL_OK")
</pallas_src>

<mosaic_0001>
module attributes {stable_mosaic.version = 11 : i64} {
  func.func @cvae_kernel(%arg0: i32, %arg1: memref<8x693xbf16, #tpu.memory_space<vmem>>, %arg2: memref<8x128xf32, #tpu.memory_space<vmem>>, %arg3: memref<693x256xbf16, #tpu.memory_space<vmem>>, %arg4: memref<1x256xf32, #tpu.memory_space<vmem>>, %arg5: memref<256x128xbf16, #tpu.memory_space<vmem>>, %arg6: memref<1x128xf32, #tpu.memory_space<vmem>>, %arg7: memref<128x256xbf16, #tpu.memory_space<vmem>>, %arg8: memref<308x256xbf16, #tpu.memory_space<vmem>>, %arg9: memref<1x256xf32, #tpu.memory_space<vmem>>, %arg10: memref<256x512xbf16, #tpu.memory_space<vmem>>, %arg11: memref<1x512xf32, #tpu.memory_space<vmem>>, %arg12: memref<8x128xf32, #tpu.memory_space<vmem>>, %arg13: memref<8x512xf32, #tpu.memory_space<vmem>>) attributes {dimension_semantics = [#tpu.dimension_semantics<parallel>], iteration_bounds = array<i64: 2>, scalar_prefetch = 0 : i64, scratch_operands = 0 : i64, tpu.core_type = #tpu.core_type<tc>, window_params = [{transform_indices = @transform_0, window_bounds = array<i64: 8, 693>}, {transform_indices = @transform_1, window_bounds = array<i64: 8, 128>}, {pipeline_mode = #tpu.pipeline_mode<synchronous>, transform_indices = @transform_2, window_bounds = array<i64: 693, 256>}, {pipeline_mode = #tpu.pipeline_mode<synchronous>, transform_indices = @transform_3, window_bounds = array<i64: 1, 256>}, {pipeline_mode = #tpu.pipeline_mode<synchronous>, transform_indices = @transform_4, window_bounds = array<i64: 256, 128>}, {pipeline_mode = #tpu.pipeline_mode<synchronous>, transform_indices = @transform_5, window_bounds = array<i64: 1, 128>}, {pipeline_mode = #tpu.pipeline_mode<synchronous>, transform_indices = @transform_6, window_bounds = array<i64: 128, 256>}, {pipeline_mode = #tpu.pipeline_mode<synchronous>, transform_indices = @transform_7, window_bounds = array<i64: 308, 256>}, {pipeline_mode = #tpu.pipeline_mode<synchronous>, transform_indices = @transform_8, window_bounds = array<i64: 1, 256>}, {pipeline_mode = #tpu.pipeline_mode<synchronous>, transform_indices = @transform_9, window_bounds = array<i64: 256, 512>}, {pipeline_mode = #tpu.pipeline_mode<synchronous>, transform_indices = @transform_10, window_bounds = array<i64: 1, 512>}, {transform_indices = @transform_11, window_bounds = array<i64: 8, 128>}, {transform_indices = @transform_12, window_bounds = array<i64: 8, 512>}]} {
    %c0 = arith.constant 0 : index
    %c0_0 = arith.constant 0 : index
    %0 = vector.load %arg1[%c0, %c0_0] : memref<8x693xbf16, #tpu.memory_space<vmem>>, vector<8x693xbf16>
    %c0_1 = arith.constant 0 : index
    %c0_2 = arith.constant 0 : index
    %1 = vector.load %arg3[%c0_1, %c0_2] : memref<693x256xbf16, #tpu.memory_space<vmem>>, vector<693x256xbf16>
    %cst = arith.constant dense<0.000000e+00> : vector<8x256xf32>
    %2 = tpu.matmul %0, %1, %cst {dimension_numbers = #tpu.dot_dimension_numbers<[1], [0], [0], [1], [0, 0, 1, 1], [], []>} : vector<8x693xbf16>, vector<693x256xbf16>, vector<8x256xf32> -> vector<8x256xf32>
    %c0_3 = arith.constant 0 : index
    %c0_4 = arith.constant 0 : index
    %3 = vector.load %arg4[%c0_3, %c0_4] : memref<1x256xf32, #tpu.memory_space<vmem>>, vector<1x256xf32>
    %4 = vector.broadcast %3 : vector<1x256xf32> to vector<8x256xf32>
    %5 = arith.addf %2, %4 : vector<8x256xf32>
    %cst_5 = arith.constant 0.000000e+00 : f32
    %6 = vector.broadcast %cst_5 : f32 to vector<8x256xf32>
    %7 = arith.maximumf %5, %6 : vector<8x256xf32>
    %8 = arith.truncf %7 : vector<8x256xf32> to vector<8x256xbf16>
    %c0_6 = arith.constant 0 : index
    %c0_7 = arith.constant 0 : index
    %9 = vector.load %arg5[%c0_6, %c0_7] : memref<256x128xbf16, #tpu.memory_space<vmem>>, vector<256x128xbf16>
    %cst_8 = arith.constant dense<0.000000e+00> : vector<8x128xf32>
    %10 = tpu.matmul %8, %9, %cst_8 {dimension_numbers = #tpu.dot_dimension_numbers<[1], [0], [0], [1], [0, 0, 1, 1], [], []>} : vector<8x256xbf16>, vector<256x128xbf16>, vector<8x128xf32> -> vector<8x128xf32>
    %c0_9 = arith.constant 0 : index
    %c0_10 = arith.constant 0 : index
    %11 = vector.load %arg6[%c0_9, %c0_10] : memref<1x128xf32, #tpu.memory_space<vmem>>, vector<1x128xf32>
    %12 = vector.broadcast %11 : vector<1x128xf32> to vector<8x128xf32>
    %13 = arith.addf %10, %12 : vector<8x128xf32>
    %c0_11 = arith.constant 0 : index
    %c0_12 = arith.constant 0 : index
    %14 = vector.load %arg12[%c0_11, %c0_12] : memref<8x128xf32, #tpu.memory_space<vmem>>, vector<8x128xf32>
    tpu.vector_store %arg12[%c0_11, %c0_12], %13 {strides = array<i32>} : memref<8x128xf32, #tpu.memory_space<vmem>>, vector<8x128xf32>,
    %c64_i32 = arith.constant 64 : i32
    %15 = tpu.dynamic_rotate %13 by %c64_i32 dim 1 : vector<8x128xf32>, i32 -> vector<8x128xf32>
    %c0_13 = arith.constant 0 : index
    %c0_14 = arith.constant 0 : index
    %16 = vector.load %arg2[%c0_13, %c0_14] : memref<8x128xf32, #tpu.memory_space<vmem>>, vector<8x128xf32>
    %cst_15 = arith.constant 5.000000e-01 : f32
    %17 = vector.broadcast %cst_15 : f32 to vector<8x128xf32>
    %18 = arith.mulf %17, %15 : vector<8x128xf32>
    %19 = math.exp %18 : vector<8x128xf32>
    %20 = arith.mulf %16, %19 : vector<8x128xf32>
    %21 = arith.addf %13, %20 : vector<8x128xf32>
    %22 = vector.extract_strided_slice %0 {offsets = [0, 385], sizes = [8, 308], strides = [1, 1]} : vector<8x693xbf16> to vector<8x308xbf16>
    %23 = arith.truncf %21 : vector<8x128xf32> to vector<8x128xbf16>
    %c0_16 = arith.constant 0 : index
    %c0_17 = arith.constant 0 : index
    %24 = vector.load %arg7[%c0_16, %c0_17] : memref<128x256xbf16, #tpu.memory_space<vmem>>, vector<128x256xbf16>
    %cst_18 = arith.constant dense<0.000000e+00> : vector<8x256xf32>
    %25 = tpu.matmul %23, %24, %cst_18 {dimension_numbers = #tpu.dot_dimension_numbers<[1], [0], [0], [1], [0, 0, 1, 1], [], []>} : vector<8x128xbf16>, vector<128x256xbf16>, vector<8x256xf32> -> vector<8x256xf32>
    %c0_19 = arith.constant 0 : index
    %c0_20 = arith.constant 0 : index
    %26 = vector.load %arg8[%c0_19, %c0_20] : memref<308x256xbf16, #tpu.memory_space<vmem>>, vector<308x256xbf16>
    %cst_21 = arith.constant dense<0.000000e+00> : vector<8x256xf32>
    %27 = tpu.matmul %22, %26, %cst_21 {dimension_numbers = #tpu.dot_dimension_numbers<[1], [0], [0], [1], [0, 0, 1, 1], [], []>} : vector<8x308xbf16>, vector<308x256xbf16>, vector<8x256xf32> -> vector<8x256xf32>
    %28 = arith.addf %25, %27 : vector<8x256xf32>
    %c0_22 = arith.constant 0 : index
    %c0_23 = arith.constant 0 : index
    %29 = vector.load %arg9[%c0_22, %c0_23] : memref<1x256xf32, #tpu.memory_space<vmem>>, vector<1x256xf32>
    %30 = vector.broadcast %29 : vector<1x256xf32> to vector<8x256xf32>
    %31 = arith.addf %28, %30 : vector<8x256xf32>
    %cst_24 = arith.constant 0.000000e+00 : f32
    %32 = vector.broadcast %cst_24 : f32 to vector<8x256xf32>
    %33 = arith.maximumf %31, %32 : vector<8x256xf32>
    %34 = arith.truncf %33 : vector<8x256xf32> to vector<8x256xbf16>
    %c0_25 = arith.constant 0 : index
    %c0_26 = arith.constant 0 : index
    %35 = vector.load %arg10[%c0_25, %c0_26] : memref<256x512xbf16, #tpu.memory_space<vmem>>, vector<256x512xbf16>
    %cst_27 = arith.constant dense<0.000000e+00> : vector<8x512xf32>
    %36 = tpu.matmul %34, %35, %cst_27 {dimension_numbers = #tpu.dot_dimension_numbers<[1], [0], [0], [1], [0, 0, 1, 1], [], []>} : vector<8x256xbf16>, vector<256x512xbf16>, vector<8x512xf32> -> vector<8x512xf32>
    %c0_28 = arith.constant 0 : index
    %c0_29 = arith.constant 0 : index
    %37 = vector.load %arg11[%c0_28, %c0_29] : memref<1x512xf32, #tpu.memory_space<vmem>>, vector<1x512xf32>
    %38 = vector.broadcast %37 : vector<1x512xf32> to vector<8x512xf32>
    %39 = arith.addf %36, %38 : vector<8x512xf32>
    %cst_30 = arith.constant 5.000000e-01 : f32
    %40 = vector.broadcast %cst_30 : f32 to vector<8x512xf32>
    %41 = arith.mulf %40, %39 : vector<8x512xf32>
    %42 = math.tanh %41 : vector<8x512xf32>
    %cst_31 = arith.constant 1.000000e+00 : f32
    %43 = vector.broadcast %cst_31 : f32 to vector<8x512xf32>
    %44 = arith.addf %43, %42 : vector<8x512xf32>
    %cst_32 = arith.constant 5.000000e-01 : f32
    %45 = vector.broadcast %cst_32 : f32 to vector<8x512xf32>
    %46 = arith.mulf %45, %44 : vector<8x512xf32>
    %c0_33 = arith.constant 0 : index
    %c0_34 = arith.constant 0 : index
    %47 = vector.load %arg13[%c0_33, %c0_34] : memref<8x512xf32, #tpu.memory_space<vmem>>, vector<8x512xf32>
    tpu.vector_store %arg13[%c0_33, %c0_34], %46 {strides = array<i32>} : memref<8x512xf32, #tpu.memory_space<vmem>>, vector<8x512xf32>,
    return
  }
  func.func @transform_0(%arg0: i32) -> (i32, i32) {
    %c0_i32 = arith.constant 0 : i32
    %c0_i32_0 = arith.constant 0 : i32
    return %arg0, %c0_i32 : i32, i32
  }
  func.func @transform_1(%arg0: i32) -> (i32, i32) {
    %c0_i32 = arith.constant 0 : i32
    %c0_i32_0 = arith.constant 0 : i32
    return %arg0, %c0_i32 : i32, i32
  }
  func.func @transform_2(%arg0: i32) -> (i32, i32) {
    %c0_i32 = arith.constant 0 : i32
    %c0_i32_0 = arith.constant 0 : i32
    %c0_i32_1 = arith.constant 0 : i32
    return %c0_i32, %c0_i32_0 : i32, i32
  }
  func.func @transform_3(%arg0: i32) -> (i32, i32) {
    %c0_i32 = arith.constant 0 : i32
    %c0_i32_0 = arith.constant 0 : i32
    %c0_i32_1 = arith.constant 0 : i32
    return %c0_i32, %c0_i32_0 : i32, i32
  }
  func.func @transform_4(%arg0: i32) -> (i32, i32) {
    %c0_i32 = arith.constant 0 : i32
    %c0_i32_0 = arith.constant 0 : i32
    %c0_i32_1 = arith.constant 0 : i32
    return %c0_i32, %c0_i32_0 : i32, i32
  }
  func.func @transform_5(%arg0: i32) -> (i32, i32) {
    %c0_i32 = arith.constant 0 : i32
    %c0_i32_0 = arith.constant 0 : i32
    %c0_i32_1 = arith.constant 0 : i32
    return %c0_i32, %c0_i32_0 : i32, i32
  }
  func.func @transform_6(%arg0: i32) -> (i32, i32) {
    %c0_i32 = arith.constant 0 : i32
    %c0_i32_0 = arith.constant 0 : i32
    %c0_i32_1 = arith.constant 0 : i32
    return %c0_i32, %c0_i32_0 : i32, i32
  }
  func.func @transform_7(%arg0: i32) -> (i32, i32) {
    %c0_i32 = arith.constant 0 : i32
    %c0_i32_0 = arith.constant 0 : i32
    %c0_i32_1 = arith.constant 0 : i32
    return %c0_i32, %c0_i32_0 : i32, i32
  }
  func.func @transform_8(%arg0: i32) -> (i32, i32) {
    %c0_i32 = arith.constant 0 : i32
    %c0_i32_0 = arith.constant 0 : i32
    %c0_i32_1 = arith.constant 0 : i32
    return %c0_i32, %c0_i32_0 : i32, i32
  }
  func.func @transform_9(%arg0: i32) -> (i32, i32) {
    %c0_i32 = arith.constant 0 : i32
    %c0_i32_0 = arith.constant 0 : i32
    %c0_i32_1 = arith.constant 0 : i32
    return %c0_i32, %c0_i32_0 : i32, i32
  }
  func.func @transform_10(%arg0: i32) -> (i32, i32) {
    %c0_i32 = arith.constant 0 : i32
    %c0_i32_0 = arith.constant 0 : i32
    %c0_i32_1 = arith.constant 0 : i32
    return %c0_i32, %c0_i32_0 : i32, i32
  }
  func.func @transform_11(%arg0: i32) -> (i32, i32) {
    %c0_i32 = arith.constant 0 : i32
    %c0_i32_0 = arith.constant 0 : i32
    return %arg0, %c0_i32 : i32, i32
  }
  func.func @transform_12(%arg0: i32) -> (i32, i32) {
    %c0_i32 = arith.constant 0 : i32
    %c0_i32_0 = arith.constant 0 : i32
    return %arg0, %c0_i32 : i32, i32
  }
}

</mosaic_0001>

<bundles_post_ra>
// kernel: tpu_custom_call.1
= control target key start
LH: loop header
LB: loop body
LE: loop exit
PB: predicated region body
PF: predicated region fallthrough
CT: control target
= control target key end

     0   :  { %s4236_s0 = inlined_call_operand.hbm [shape: bf16[16,693], index: 0, kind: input, shape index: {}]   ;;  %s4237_s1 = inlined_call_operand.hbm [shape: f32[16,128], index: 1, kind: input, shape index: {}]   ;;  %s4238_s2 = inlined_call_operand.hbm [shape: bf16[693,256], index: 2, kind: input, shape index: {}]   ;;  %s4239_s3 = inlined_call_operand.vmem [shape: f32[1,256], index: 3, kind: input, shape index: {}]   ;;  %s4240_s4 = inlined_call_operand.hbm [shape: bf16[256,128], index: 4, kind: input, shape index: {}]   ;;  %s4241_s5 = inlined_call_operand.vmem [shape: f32[1,128], index: 5, kind: input, shape index: {}]   ;;  %s4242_s6 = inlined_call_operand.hbm [shape: bf16[128,256], index: 6, kind: input, shape index: {}]   ;;  %s4243_s7 = inlined_call_operand.hbm [shape: bf16[308,256], index: 7, kind: input, shape index: {}]   ;;  %s4244_s8 = inlined_call_operand.vmem [shape: f32[1,256], index: 8, kind: input, shape index: {}]   ;;  %s4245_s9 = inlined_call_operand.hbm [shape: bf16[256,512], index: 9, kind: input, shape index: {}]   ;;  %s4246_s10 = inlined_call_operand.vmem [shape: f32[1,512], index: 10, kind: input, shape index: {}]   ;;  %s4247_s11 = inlined_call_operand.hbm [shape: f32[16,128], index: 11, kind: output, shape index: {0}]   ;;  %s4248_s12 = inlined_call_operand.hbm [shape: f32[16,512], index: 12, kind: output, shape index: {1}]  }
   0x1   :  { %4257 = sst [smem:[#allocation24_spill]] %s4236_s0 }
   0x2   :  { %4258 = sst [smem:[#allocation25_spill]] %s4238_s2 }
   0x3   :  { %4259 = sst [smem:[#allocation26_spill]] %s4240_s4 }
   0x4   :  { %4260 = sst [smem:[#allocation27_spill]] %s4242_s6 }
   0x5   :  { %4261 = sst [smem:[#allocation28_spill]] %s4244_s8 }
   0x6   :  { %4262 = sst [smem:[#allocation29_spill]] %s4246_s10 }
   0x7   :  { %4263 = sst [smem:[#allocation30_spill]] %s4247_s11 }
   0x8   :  { %4264 = sst [smem:[#allocation31_spill]] %s4248_s12 }
   0x9   :  { %18 = vsyncpa [#allocation3], 0 }
   0xa   :  { %20 = vsyncpa [#allocation3 + $0x1], 0 }
   0xb   :  { %21 = vsyncpa [#allocation6], 0 }
   0xc   :  { %23 = vsyncpa [#allocation6 + $0x1], 0 }
   0xd   :  { %24 = vsyncpa [#allocation9], 0 }
   0xe   :  { %25 = vsyncpa [#allocation12], 0 }
   0xf   :  { %26 = vsyncpa [#allocation4], 0 }
  0x10   :  { %28 = vsyncpa [#allocation4 + $0x1], 0 }
  0x11   :  { %29 = vsyncpa [#allocation16], 0 }
  0x12   :  { %31 = vsyncpa [#allocation16 + $0x1], 0  ;;  %s3795_s21 = smov 0   ;;  %s3797_s22 = smov 0  }
  0x13   :  { %s3799_s23 = smov 0   ;;  %s3801_s24 = smov 0  }
  0x14 LB: > { %s3711_s25 = smov [#allocation7]   ;;  %s3816_s27 = sadd.s32 4294967295, %s3709_s24   ;;  %s3709_s24 = sphi %s3801_s24, %s4297_s24   ;;  %s3705_s23 = sphi %s3799_s23, %s4296_s23   ;;  %s3701_s22 = sphi %s3797_s22, %s4295_s22   ;;  %s3697_s21 = sphi %s3795_s21, %s4294_s21  }
  0x15   : > { %s347_s26 = sshll.u32 %s3711_s25, 4  ;;  %p2640_p0 = scmp.ge.s32.totalorder %s3709_s24, 1  ;;  %s3821_s26 = int_to_ptr.vmem [resolvable:$true] %s347_s26 }
  0x16   : > { %p4253_p1 = scmp.eq.s32.totalorder %s3816_s27, 0  ;;  %p335_p2 = scmp.lt.s32.totalorder %s3709_s24, 3 }
  0x17   : > { %s3712_s29 = smov [#allocation8]   ;;  %s3713_s14 = smov [#allocation11]  }
  0x18   : > { %p3823_p3 = pnand %p2640_p0, %p335_p2  ;;  %s363_s30 = sshll.u32 %s3712_s29, 4  ;;  %s3836_s30 = int_to_ptr.vmem [resolvable:$true] %s363_s30 }
  0x19   : > { %s3838_s15 = sshll.u32 %s3713_s14, 4  ;;  %s4267_s2 = sld [smem:[#allocation25_spill]]  ;;  %s393_s15 = int_to_ptr.vmem [resolvable:$true] %s3838_s15 }
  0x1a   : > { %s4265_s28 = scalar_select %p3823_p3, 1, 0 }
  0x1b   : > { %p2964_p5 = pneg %p3823_p3 }
  0x1d   : > { %p3832_p6 = pnand %p2964_p5, %p4253_p1 }
  0x1f   : > { %s3395_s18 = scalar_lea.hbm %s4267_s2, 11136  ;;  %p3848_p8 = pneg %p3832_p6 }
  0x20   : > { %p3396_p7 = scmp.ne.s32.totalorder %s4267_s2, %s3395_s18  ;;  %p3402_p11 = scmp.lt.u32.totalorder %s3395_s18, %s4267_s2 }
  0x22   : > { %p3398_p9 = pnand %p3848_p8, %p3396_p7 }
  0x24   : > { %p3399_p10 = pneg %p3398_p9 }
  0x26   : > { %p3404_p12 = pnand %p3402_p11, %p3399_p10 }
  0x28   : > { %3407 = shalt.err (!%p3404_p12)
}
  0x29   : > { %s3408_s16 = scalar_lea.vmem %s3821_s26, 11136  ;;  %p3416_p5 = scmp.lt.s32.totalorder %s3821_s26, %s3821_s26 }
  0x2a   : > { %p3409_p13 = scmp.ne.s32.totalorder %s3821_s26, %s3408_s16  ;;  %p3417_p4 = scmp.lt.s32.totalorder %s3408_s16, %s3408_s16 }
  0x2c   : > { %p3411_p0 = pnand %p3409_p13, %p3848_p8  ;;  %p3418_p7 = por %p3417_p4, %p3416_p5 }
  0x2e   : > { %p3412_p2 = pneg %p3411_p0 }
  0x30   : > { %p3419_p9 = pnand %p3418_p7, %p3412_p2 }
  0x32   : > { %3422 = shalt.err (!%p3419_p9)
}
  0x33   : > { %s4251_s17 = smov 128   ;;  %s3715_s18 = smov 8  }
  0x34   : > { %2967 = dma.hbm_to_vmem [thread:$0]  (!%p3832_p6), %s4267_s2, 11136, %s3821_s26, [#allocation6], %s4251_s17, %s4251_s17, %s3715_s18  }
  0x35   : > { %s4269_s4 = sld [smem:[#allocation26_spill]] }
  0x3b   : > { %s3423_s16 = scalar_lea.hbm %s4269_s4, 2048 }
  0x3c   : > { %p3424_p4 = scmp.ne.s32.totalorder %s4269_s4, %s3423_s16  ;;  %p3430_p12 = scmp.lt.u32.totalorder %s3423_s16, %s4269_s4 }
  0x3e   : > { %p3426_p10 = pnand %p3424_p4, %p3848_p8 }
  0x40   : > { %p3427_p11 = pneg %p3426_p10 }
  0x42   : > { %p3432_p13 = pnand %p3430_p12, %p3427_p11 }
  0x44   : > { %3435 = shalt.err (!%p3432_p13)
}
  0x45   : > { %s3436_s26 = scalar_lea.vmem %s3836_s30, 2048  ;;  %p3444_p7 = scmp.lt.s32.totalorder %s3836_s30, %s3836_s30 }
  0x46   : > { %p3437_p0 = scmp.ne.s32.totalorder %s3836_s30, %s3436_s26  ;;  %p3445_p9 = scmp.lt.s32.totalorder %s3436_s26, %s3436_s26 }
  0x48   : > { %p3439_p2 = pnand %p3437_p0, %p3848_p8  ;;  %p3446_p4 = por %p3445_p9, %p3444_p7 }
  0x4a   : > { %p3440_p5 = pneg %p3439_p2 }
  0x4c   : > { %p3447_p10 = pnand %p3446_p4, %p3440_p5 }
  0x4e   : > { %3450 = shalt.err (!%p3447_p10)
}
  0x4f   : > { %s3716_s10 = smov 64   ;;  %s3717_s8 = smov 4  }
  0x50   : > { %2970 = dma.hbm_to_vmem [thread:$0]  (!%p3832_p6), %s4269_s4, 2048, %s3836_s30, [#allocation9], %s3716_s10, %s3716_s10, %s3717_s8  }
  0x51   : > { %s3451_s29 = scalar_lea.hbm %s4243_s7, 4992 }
  0x52   : > { %p3452_p11 = scmp.ne.s32.totalorder %s4243_s7, %s3451_s29  ;;  %p3458_p0 = scmp.lt.u32.totalorder %s3451_s29, %s4243_s7 }
  0x54   : > { %p3454_p12 = pnand %p3452_p11, %p3848_p8 }
  0x56   : > { %p3455_p13 = pneg %p3454_p12 }
  0x58   : > { %p3460_p2 = pnand %p3458_p0, %p3455_p13 }
  0x5a   : > { %3463 = shalt.err (!%p3460_p2)
}
  0x5b   : > { %s3464_s11 = scalar_lea.vmem %s393_s15, 4992  ;;  %p3472_p4 = scmp.lt.s32.totalorder %s393_s15, %s393_s15 }
  0x5c   : > { %p3465_p5 = scmp.ne.s32.totalorder %s393_s15, %s3464_s11  ;;  %p3473_p10 = scmp.lt.s32.totalorder %s3464_s11, %s3464_s11 }
  0x5e   : > { %p3467_p7 = pnand %p3465_p5, %p3848_p8  ;;  %p3474_p1 = por %p3473_p10, %p3472_p4 }
  0x60   : > { %p3468_p9 = pneg %p3467_p7 }
  0x62   : > { %p3475_p3 = pnand %p3474_p1, %p3468_p9 }
  0x64   : > { %3478 = shalt.err (!%p3475_p3)
}
  0x65   : > { %s4270_s30 = smov 128   ;;  %s3718_s8 = smov [#allocation10]  }
  0x66   : > { %2976 = dma.hbm_to_vmem [thread:$0]  (!%p3832_p6), %s4243_s7, 4992, %s393_s15, [#allocation12], %s4270_s30, %s4270_s30, %s3715_s18  }
  0x67   : > { %s379_s12 = sshll.u32 %s3718_s8, 4  ;;  %s3719_s19 = smov [#allocation13]   ;;  %s380_s12 = int_to_ptr.vmem [resolvable:$true] %s379_s12 }
  0x68   : > { %s408_s20 = sshll.u32 %s3719_s19, 4  ;;  %s4271_s6 = sld [smem:[#allocation27_spill]]  ;;  %s409_s20 = int_to_ptr.vmem [resolvable:$true] %s408_s20 }
  0x6e   : > { %s3479_s16 = scalar_lea.hbm %s4271_s6, 2048 }
  0x6f   : > { %p3480_p1 = scmp.ne.s32.totalorder %s4271_s6, %s3479_s16  ;;  %p3486_p12 = scmp.lt.u32.totalorder %s3479_s16, %s4271_s6 }
  0x71   : > { %p3482_p3 = pnand %p3480_p1, %p3848_p8 }
  0x73   : > { %p3483_p11 = pneg %p3482_p3 }
  0x75   : > { %p3488_p13 = pnand %p3486_p12, %p3483_p11 }
  0x77   : > { %3491 = shalt.err (!%p3488_p13)
}
  0x78   : > { %s3492_s15 = scalar_lea.vmem %s380_s12, 2048  ;;  %p3500_p7 = scmp.lt.s32.totalorder %s380_s12, %s380_s12 }
  0x79   : > { %p3493_p0 = scmp.ne.s32.totalorder %s380_s12, %s3492_s15  ;;  %p3501_p9 = scmp.lt.s32.totalorder %s3492_s15, %s3492_s15 }
  0x7b   : > { %p3495_p2 = pnand %p3493_p0, %p3848_p8  ;;  %p3502_p4 = por %p3501_p9, %p3500_p7 }
  0x7d   : > { %p3496_p5 = pneg %p3495_p2 }
  0x7f   : > { %p3503_p10 = pnand %p3502_p4, %p3496_p5 }
  0x81   : > { %3506 = shalt.err (!%p3503_p10)
}
  0x82   : > { %2973 = dma.hbm_to_vmem [thread:$0]  (!%p3832_p6), %s4271_s6, 2048, %s380_s12, [#allocation9], %s4270_s30, %s4270_s30, %s3715_s18  }
  0x83   : > { %s3507_s29 = scalar_lea.hbm %s4245_s9, 8192 }
  0x84   : > { %p3508_p1 = scmp.ne.s32.totalorder %s4245_s9, %s3507_s29  ;;  %p3514_p12 = scmp.lt.u32.totalorder %s3507_s29, %s4245_s9 }
  0x86   : > { %p3510_p3 = pnand %p3508_p1, %p3848_p8 }
  0x88   : > { %p3511_p11 = pneg %p3510_p3 }
  0x8a   : > { %p3516_p13 = pnand %p3514_p12, %p3511_p11 }
  0x8c   : > { %3519 = shalt.err (!%p3516_p13)
}
  0x8d   : > { %s3520_s17 = scalar_lea.vmem %s409_s20, 8192  ;;  %p3528_p7 = scmp.lt.s32.totalorder %s409_s20, %s409_s20 }
  0x8e   : > { %p3521_p0 = scmp.ne.s32.totalorder %s409_s20, %s3520_s17  ;;  %p3529_p9 = scmp.lt.s32.totalorder %s3520_s17, %s3520_s17 }
  0x90   : > { %p3523_p2 = pnand %p3521_p0, %p3848_p8  ;;  %p3530_p4 = por %p3529_p9, %p3528_p7 }
  0x92   : > { %p3524_p5 = pneg %p3523_p2 }
  0x94   : > { %p3531_p10 = pnand %p3530_p4, %p3524_p5 }
  0x96   : > { %3534 = shalt.err (!%p3531_p10)
}
  0x97   : > { %s3720_s18 = smov 256   ;;  %s3721_s25 = smov 16  }
  0x98   : > { %2979 = dma.hbm_to_vmem [thread:$0]  (!%p3832_p6), %s4245_s9, 8192, %s409_s20, [#allocation12], %s3720_s18, %s3720_s18, %s3721_s25  }
  0x99   : > { %s2639_s15 = sadd.s32 4294967294, %s3709_s24   ;;  %s3958_s2 = sadd.s32 1, %s3709_s24  }
  0x9a   : > { %s44_s10 = sadd.s32 1, %s3705_s23  ;;  %s41_s8 = ssub.s32 %s3709_s24, %s3958_s2 }
  0x9b   : > { %p51_p8 = scmp.ne.s32.totalorder %s3705_s23, %s3701_s22  ;;  %p42_p1 = scmp.eq.s32.totalorder %s41_s8, 0 }
  0x9c   : > { %p52_p3 = scmp.eq.s32.totalorder %s3709_s24, 0  ;;  %p57_p11 = scmp.ne.s32.totalorder %s3701_s22, %s3697_s21 }
  0x9d   : > { %p296_p12 = scmp.eq.s32.totalorder %s3816_s27, 1  ;;  %p4272_p0 = scmp.eq.s32.totalorder %s3816_s27, 0 }
  0x9e   : > { %s3970_s13 = scalar_select %p42_p1, %s3705_s23, %s44_s10  }
  0x9f   : > { %p53_p13 = por %p52_p3, %p51_p8  ;;  %p3974_p2 = por %p4272_p0, %p57_p11 }
  0xa0   : > { %p3978_p6 = por %p296_p12, %p51_p8  ;;  %p302_p5 = scmp.eq.s32.totalorder %s2639_s15, 1 }
  0xa1   : > { %s4273_s20 = scalar_select %p3974_p2, 1, 0 }
  0xa2   : > { %s4274_s19 = scalar_select %p3978_p6, 1, 0 }
  0xa3   : > { %p2999_p7 = scmp.lt.s32.totalorder %s3709_s24, 2  ;;  %s3984_s29 = sand.u32 1, %s3705_s23  }
  0xa4   : > { %p3986_p9 = por %p302_p5, %p57_p11  ;;  %s2933_s16 = smul.u32 24, %s3984_s29 }
  0xa5   : > { %p3991_p4 = pnand %p2999_p7, %p53_p13  ;;  %s2934_s11 = smul.u32 384, %s3709_s24 }
  0xa6   : > { %s4275_s14 = scalar_select %p3986_p9, 1, 0 }
  0xa7   : > { %s4277_s0 = sld [smem:[#allocation24_spill]]  ;;  %s429_s12 = scalar_lea.vmem [#allocation2], %s2933_s16 }
  0xa8   : > { %s437_s15 = sshll.u32 %s429_s12, 4  ;;  %s426_s10 = scalar_lea.sflag [#allocation3], %s3984_s29  ;;  %s4002_s15 = int_to_ptr.vmem [resolvable:$true] %s437_s15 }
  0xa9   : > { %p3537_p8 = pneg %p3991_p4 }
  0xad   : > { %s4000_s30 = scalar_lea.hbm %s4277_s0, %s2934_s11  ;;  %s3540_s25 = scalar_lea.hbm %s4277_s0, 768 }
  0xae   : > { %s3535_s8 = scalar_lea.hbm %s4000_s30, 384  ;;  %p3541_p11 = scmp.lt.u32.totalorder %s4000_s30, %s4277_s0 }
  0xaf   : > { %p3536_p10 = scmp.ne.s32.totalorder %s4000_s30, %s3535_s8  ;;  %p3542_p12 = scmp.lt.u32.totalorder %s3540_s25, %s3535_s8 }
  0xb0   : > { %p3544_p0 = scmp.lt.u32.totalorder %s3535_s8, %s4000_s30 }
  0xb1   : > { %p3538_p1 = pnand %p3537_p8, %p3536_p10  ;;  %p3543_p13 = por %p3542_p12, %p3541_p11 }
  0xb3   : > { %p3539_p3 = pneg %p3538_p1  ;;  %p3545_p5 = por %p3544_p0, %p3543_p13 }
  0xb5   : > { %p3546_p7 = pnand %p3545_p5, %p3539_p3 }
  0xb7   : > { %3549 = shalt.err (!%p3546_p7)
}
  0xb8   : > { %s3550_s16 = scalar_lea.vmem %s4002_s15, 384  ;;  %s3722_s12 = smov [#allocation2]  }
  0xb9   : > { %p3551_p10 = scmp.ne.s32.totalorder %s4002_s15, %s3550_s16  ;;  %s3555_s18 = sshll.u32 %s3722_s12, 4  ;;  %s3556_s18 = int_to_ptr.vmem [resolvable:$false] %s3555_s18 }
  0xba   : > { %s3557_s4 = scalar_lea.vmem %s3556_s18, 768  ;;  %p3558_p6 = scmp.lt.s32.totalorder %s4002_s15, %s3556_s18 }
  0xbb   : > { %p3553_p1 = pnand %p3551_p10, %p3537_p8  ;;  %p3559_p11 = scmp.lt.s32.totalorder %s3557_s4, %s3550_s16 }
  0xbd   : > { %p3554_p9 = pneg %p3553_p1  ;;  %p3560_p12 = por %p3559_p11, %p3558_p6 }
  0xbf   : > { %p3561_p13 = pnand %p3560_p12, %p3554_p9 }
  0xc1   : > { %3564 = shalt.err (!%p3561_p13)
}
  0xc2   : > { %2983 = dma.hbm_to_vmem [thread:$0]  (!%p3991_p4), %s4000_s30, 384, %s4002_s15, %s426_s10  }
  0xc3   : > { %s2648_s17 = sshll.u32 %s3984_s29, 3  ;;  %s2649_s8 = sshll.u32 %s3709_s24, 7 }
  0xc4   : > { %s4035_s12 = scalar_lea.hbm %s4237_s1, %s2649_s8  ;;  %s448_s16 = scalar_lea.vmem [#allocation5], %s2648_s17 }
  0xc5   : > { %s455_s18 = sshll.u32 %s448_s16, 4  ;;  %s4278_s4 = sand.u32 1, %s3709_s24   ;;  %s456_s18 = int_to_ptr.vmem [resolvable:$true] %s455_s18 }
  0xc6   : > { %s445_s0 = scalar_lea.sflag [#allocation6], %s4278_s4  ;;  %s3565_s6 = scalar_lea.hbm %s4035_s12, 128 }
  0xc7   : > { %p3566_p6 = scmp.ne.s32.totalorder %s4035_s12, %s3565_s6  ;;  %s3570_s15 = scalar_lea.hbm %s4237_s1, 256 }
  0xc8   : > { %p3571_p0 = scmp.lt.u32.totalorder %s4035_s12, %s4237_s1  ;;  %p3572_p5 = scmp.lt.u32.totalorder %s3570_s15, %s3565_s6 }
  0xc9   : > { %p3568_p9 = pnand %p3566_p6, %p3537_p8  ;;  %p3574_p10 = scmp.lt.u32.totalorder %s3565_s6, %s4035_s12 }
  0xca   : > { %p3573_p7 = por %p3572_p5, %p3571_p0 }
  0xcb   : > { %p3569_p3 = pneg %p3568_p9 }
  0xcc   : > { %p3575_p1 = por %p3574_p10, %p3573_p7 }
  0xce   : > { %p3576_p11 = pnand %p3575_p1, %p3569_p3 }
  0xd0   : > { %3579 = shalt.err (!%p3576_p11)
}
  0xd1   : > { %s3580_s17 = scalar_lea.vmem %s456_s18, 128  ;;  %s3723_s11 = smov [#allocation5]  }
  0xd2   : > { %p3581_p12 = scmp.ne.s32.totalorder %s456_s18, %s3580_s17  ;;  %s3585_s25 = sshll.u32 %s3723_s11, 4  ;;  %s3586_s25 = int_to_ptr.vmem [resolvable:$false] %s3585_s25 }
  0xd3   : > { %s3587_s16 = scalar_lea.vmem %s3586_s25, 256  ;;  %p3588_p9 = scmp.lt.s32.totalorder %s456_s18, %s3586_s25 }
  0xd4   : > { %p3583_p13 = pnand %p3581_p12, %p3537_p8  ;;  %p3589_p2 = scmp.lt.s32.totalorder %s3587_s16, %s3580_s17 }
  0xd6   : > { %p3584_p6 = pneg %p3583_p13  ;;  %p3590_p0 = por %p3589_p2, %p3588_p9 }
  0xd8   : > { %p3591_p5 = pnand %p3590_p0, %p3584_p6 }
  0xda   : > { %3594 = shalt.err (!%p3591_p5)
}
  0xdb   : > { %2986 = dma.hbm_to_vmem [thread:$0]  (!%p3991_p4), %s4035_s12, 128, %s456_s18, %s445_s0  }
  0xdc   : > { %p4279_p3 = scmp.ne.s32.totalorder %s4265_s28, 0 }
  0xdd   : > { %s4061_s6 = sand.u32 (!%p4279_p3), 1, %s3701_s22   ;;  %p4280_p2 = scmp.ne.s32.totalorder (!%p4279_p3), %s4273_s20, 0 }
  0xde   : > { %464 = sbr.rel (%p4279_p3) target bundleno = 1462 (0x5b6), region = 64  ;;  %s467_s29 = scalar_lea.sflag (!%p4279_p3), [#allocation3], %s4061_s6 }
  0xdf   : > { %s2935_s4 = smul.u32 (!%p4279_p3), 24, %s4061_s6 }
  0xe1   : > { %s4065_s30 = scalar_lea.vmem (!%p4279_p3), [#allocation2], %s2935_s4 }
  0xe5   : > { %3668 = dma.done.wait (%p4280_p2), %s467_s29, 384  }
  0xe6   : > { %3670 = vsyncadd (%p4280_p2), %s467_s29, 4294966912  ;;  %s475_s0 = sand.u32 1, %s3816_s27   ;;  %s2651_s28 = sshll.u32 %s4061_s6, 3 }
  0xe7   : > { %s476_s26 = scalar_lea.sflag [#allocation6], %s475_s0  ;;  %s4075_s12 = scalar_lea.vmem [#allocation5], %s2651_s28 }
  0xe8   : > { %3672 = dma.done.wait (%p4280_p2), %s476_s26, 128  }
  0xe9   : > { %3674 = vsyncadd (%p4280_p2), %s476_s26, 4294967168  ;;  %p4281_p4 = scmp.eq.s32.totalorder %s3816_s27, 0 }
  0xeb   : > { %3676 = dma.done.wait (%p4281_p4), [#allocation6], 11136   ;;  %p4282_p8 = pmov %p4281_p4 }
  0xec   : > { %p4283_p7 = pmov %p4281_p4 }
  0xed   : > { %3678 = vsyncadd (%p4282_p8), [#allocation6], 4294956160 }
  0xee   : > { %3680 = dma.done.wait (%p4283_p7), [#allocation9], 4096   ;;  %p4284_p10 = pmov %p4281_p4 }
  0xef   : > { %p4285_p1 = pmov %p4281_p4 }
  0xf0   : > { %3682 = vsyncadd (%p4284_p10), [#allocation9], 4294963200 }
  0xf1   : > { %3684 = dma.done.wait (%p4285_p1), [#allocation12], 13184   ;;  %p4286_p11 = pmov %p4285_p1 }
  0xf2   : > { %v3053_v0 = vld [vmem:[#allocation7 + $0x4] ss:$8 sps:$4 sm:$0xff]   ;;  %v3055_v1 = vld [vmem:[#allocation7] ss:$8 sps:$4 sm:$0xff]   ;;  %v3056_v2 = vld [vmem:[#allocation7 + $0x14] ss:$8 sps:$4 sm:$0xff]  }
  0xf3   : > { %3686 = vsyncadd (%p4286_p11), [#allocation12], 4294954112  ;;  %1122 = vmatprep.subr.bf16.mxu0 %v3053_v0  ;;  %v3058_v3 = vld [vmem:[#allocation7 + $0x10] ss:$8 sps:$4 sm:$0xff]   ;;  %v3059_v4 = vld [vmem:[#allocation7 + $0x24] ss:$8 sps:$4 sm:$0xff]  }
  0xf4   : > { %1123 = vmatpush1.bf16.msra.mxu0 %v3055_v1  ;;  %v3061_v5 = vld [vmem:[#allocation7 + $0x20] ss:$8 sps:$4 sm:$0xff]   ;;  %v3062_v6 = vld [vmem:[#allocation7 + $0x34] ss:$8 sps:$4 sm:$0xff]   ;;  %v3064_v7 = vld [vmem:[#allocation7 + $0x30] ss:$8 sps:$4 sm:$0xff]  }
  0xf5   : > { %1124 = vmatprep.subr.bf16.mxu0 %v3056_v2  ;;  %v3065_v8 = vld [vmem:[#allocation7 + $0x44] ss:$8 sps:$4 sm:$0xff]   ;;  %v3067_v9 = vld [vmem:[#allocation7 + $0x40] ss:$8 sps:$4 sm:$0xff]   ;;  %v3068_v10 = vld [vmem:[#allocation7 + $0x54] ss:$8 sps:$4 sm:$0xff]  }
  0xf6   : > { %v3070_v11 = vld [vmem:[#allocation7 + $0x50] ss:$8 sps:$4 sm:$0xff]   ;;  %v3071_v12 = vld [vmem:[#allocation7 + $0x64] ss:$8 sps:$4 sm:$0xff]   ;;  %v3073_v15 = vld [vmem:[#allocation7 + $0x60] ss:$8 sps:$4 sm:$0xff]  }
  0xf7   : > { %v551_v13 = vld [vmem:[%s4065_s30] sm:$0xff]  ;;  %v4095_v35 = vld [vmem:[%s4065_s30 + $0x8] sm:$0xff]  ;;  %v3196_v47 = vld [vmem:[#allocation8 + $0x58] sm:$0xff]   ;;  %vm1108_vm0 = vcmask 433152   ;;  %vm1112_vm1 = vcmask 1041408   ;;  %vm1113_vm2 = vcmask 1042432  }
  0xf8   : > { %1125 = vmatpush1.bf16.msra.mxu0 %v3058_v3  ;;  %v2660_v14 = vcombine.high %v551_v13, %v551_v13  ;;  %v3074_v16 = vld [vmem:[#allocation7 + $0x74] ss:$8 sps:$4 sm:$0xff]   ;;  %v3076_v17 = vld [vmem:[#allocation7 + $0x70] ss:$8 sps:$4 sm:$0xff]   ;;  %v3077_v18 = vld [vmem:[#allocation7 + $0x84] ss:$8 sps:$4 sm:$0xff]   ;;  %v2659_v40 = vcombine.low %v551_v13, %v551_v13  ;;  %v4099_v43 = vcombine.high %v4095_v35, %v4095_v35 }
  0xf9   : > { %1126 = vmatprep.subr.bf16.mxu0 %v3059_v4  ;;  %v3079_v19 = vld [vmem:[#allocation7 + $0x80] ss:$8 sps:$4 sm:$0xff]   ;;  %v3080_v20 = vld [vmem:[#allocation7 + $0x94] ss:$8 sps:$4 sm:$0xff]   ;;  %v3082_v21 = vld [vmem:[#allocation7 + $0x90] ss:$8 sps:$4 sm:$0xff]  }
  0xfa   : > { %1154 = vmatprep.mubr.bf16.mxu0 %v2660_v14  ;;  %v3083_v22 = vld [vmem:[#allocation7 + $0xa4] ss:$8 sps:$4 sm:$0xff]   ;;  %v3085_v23 = vld [vmem:[#allocation7 + $0xa0] ss:$8 sps:$4 sm:$0xff]   ;;  %v3086_v24 = vld [vmem:[#allocation7 + $0xb4] ss:$8 sps:$4 sm:$0xff]  }
  0xfb   : > { %v3088_v25 = vld [vmem:[#allocation7 + $0xb0] ss:$8 sps:$4 sm:$0xff]   ;;  %v3089_v26 = vld [vmem:[#allocation7 + $0xc4] ss:$8 sps:$4 sm:$0xff]   ;;  %v3091_v27 = vld [vmem:[#allocation7 + $0xc0] ss:$8 sps:$4 sm:$0xff]  }
  0xfc   : > { %1127 = vmatpush1.bf16.msra.mxu0 %v3061_v5  ;;  %v3092_v28 = vld [vmem:[#allocation7 + $0xd4] ss:$8 sps:$4 sm:$0xff]   ;;  %v3094_v29 = vld [vmem:[#allocation7 + $0xd0] ss:$8 sps:$4 sm:$0xff]   ;;  %v3095_v30 = vld [vmem:[#allocation7 + $0xe4] ss:$8 sps:$4 sm:$0xff]  }
  0xfd   : > { %1128 = vmatprep.subr.bf16.mxu0 %v3062_v6  ;;  %v3097_v31 = vld [vmem:[#allocation7 + $0xe0] ss:$8 sps:$4 sm:$0xff]   ;;  %v3098_v32 = vld [vmem:[#allocation7 + $0xf4] ss:$8 sps:$4 sm:$0xff]   ;;  %v3100_v33 = vld [vmem:[#allocation7 + $0xf0] ss:$8 sps:$4 sm:$0xff]  }
  0xfe   : > { %v3105_v34 = vld [vmem:[#allocation7 + $0x104] ss:$8 sps:$4 sm:$0xff]   ;;  %v3190_v36 = vld [vmem:[#allocation8 + $0x40] sm:$0xff]   ;;  %v3103_v38 = vld [vmem:[#allocation7 + $0x100] ss:$8 sps:$4 sm:$0xff]   ;;  %s3725_s20 = smov 127  }
  0xff   : > { %v3191_v37 = vld [vmem:[#allocation8] sm:$0xff]   ;;  %2901 = vmatprep.subr.bf16.mxu1 %v3190_v36  ;;  %v3192_v39 = vld [vmem:[#allocation8 + $0x48] sm:$0xff]   ;;  %v3194_v44 = vld [vmem:[#allocation8 + $0x50] sm:$0xff]   ;;  %1489 = vrot.lane.b32.xlu1 %v4099_v43, %s3725_s20  ;;  %vm1495_vm3 = vcmask 1039360   ;;  %vm1695_vm4 = vcmask 424960   ;;  %s3727_s17 = smov 64  }
 0x100   : > { %1129 = vmatpush1.bf16.msra.mxu0 %v3064_v7  ;;  %2902 = vmatpush3.bf16.msra.mxu1 %v3191_v37  ;;  %v3193_v41 = vld [vmem:[#allocation8 + $0x8] sm:$0xff]   ;;  %v3108_v42 = vld [vmem:[#allocation7 + $0x114] ss:$8 sps:$4 sm:$0xff]   ;;  %v3106_v45 = vld [vmem:[#allocation7 + $0x110] ss:$8 sps:$4 sm:$0xff]   ;;  %s4144_s11 = scalar_lea.vmem [#allocation14], %s2651_s28 }
 0x101   : > { %1130 = vmatprep.subr.bf16.mxu0 %v3065_v8  ;;  %2903 = vmatprep.subr.bf16.mxu1 %v3192_v39  ;;  %v3195_v46 = vld [vmem:[#allocation8 + $0x10] sm:$0xff]   ;;  %v3114_v50 = vld [vmem:[#allocation7 + $0x134] ss:$8 sps:$4 sm:$0xff]   ;;  %v3112_v54 = vld [vmem:[#allocation7 + $0x130] ss:$8 sps:$4 sm:$0xff]   ;;  %s4287_s4 = sld [smem:[#allocation28_spill]] }
 0x102   : > { %v3111_v48 = vld [vmem:[#allocation7 + $0x124] ss:$8 sps:$4 sm:$0xff]   ;;  %v3109_v49 = vld [vmem:[#allocation7 + $0x120] ss:$8 sps:$4 sm:$0xff]   ;;  %v3197_v51 = vld [vmem:[#allocation8 + $0x18] sm:$0xff]   ;;  %s2895_s29 = sshll.u32 %s3816_s27, 7 }
 0x103   : > { %v3198_v52 = vld [vmem:[#allocation8 + $0x60] sm:$0xff]   ;;  %v3200_v55 = vld [vmem:[#allocation8 + $0x68] sm:$0xff]   ;;  %v640_v39 = vld [vmem:[#allocation7 + $0x2b0] sm:$0x77]  ;;  %s4288_s26 = sld [smem:[#allocation30_spill]]  ;;  %p4289_p13 = scmp.ne.s32.totalorder %s4274_s19, 0 }
 0x104   : > { %1131 = vmatpush1.bf16.msra.mxu0 %v3067_v9  ;;  %2904 = vmatpush3.bf16.msra.mxu1 %v3193_v41  ;;  %v3199_v53 = vld [vmem:[#allocation8 + $0x20] sm:$0xff]   ;;  %v3117_v56 = vld [vmem:[#allocation7 + $0x144] ss:$8 sps:$4 sm:$0xff]   ;;  %v3115_v58 = vld [vmem:[#allocation7 + $0x140] ss:$8 sps:$4 sm:$0xff]   ;;  %s3728_s15 = smov [#allocation14]  }
 0x105   : > { %1132 = vmatprep.subr.bf16.mxu0 %v3068_v10  ;;  %2905 = vmatprep.subr.bf16.mxu1 %v3194_v44  ;;  %v3201_v57 = vld [vmem:[#allocation8 + $0x28] sm:$0xff]   ;;  %v3120_v59 = vld [vmem:[#allocation7 + $0x154] ss:$8 sps:$4 sm:$0xff]   ;;  %v3118_v60 = vld [vmem:[#allocation7 + $0x150] ss:$8 sps:$4 sm:$0xff]   ;;  %s3599_s10 = sshll.u32 %s3728_s15, 4  ;;  %s3600_s10 = int_to_ptr.vmem [resolvable:$false] %s3599_s10 }
 0x106   : > { %v3123_v61 = vld [vmem:[#allocation7 + $0x164] ss:$8 sps:$4 sm:$0xff]   ;;  %v3121_v62 = vld [vmem:[#allocation7 + $0x160] ss:$8 sps:$4 sm:$0xff]   ;;  %v3126_v63 = vld [vmem:[#allocation7 + $0x174] ss:$8 sps:$4 sm:$0xff]  }
 0x107   : > { %v3124_v0 = vld [vmem:[#allocation7 + $0x170] ss:$8 sps:$4 sm:$0xff]   ;;  %v3129_v1 = vld [vmem:[#allocation7 + $0x184] ss:$8 sps:$4 sm:$0xff]   ;;  %v3127_v2 = vld [vmem:[#allocation7 + $0x180] ss:$8 sps:$4 sm:$0xff]  }
 0x108   : > { %1133 = vmatpush1.bf16.msra.mxu0 %v3070_v11  ;;  %2906 = vmatpush3.bf16.msra.mxu1 %v3195_v46  ;;  %v3132_v3 = vld [vmem:[#allocation7 + $0x194] ss:$8 sps:$4 sm:$0xff]   ;;  %v3130_v4 = vld [vmem:[#allocation7 + $0x190] ss:$8 sps:$4 sm:$0xff]   ;;  %v3135_v5 = vld [vmem:[#allocation7 + $0x1a4] ss:$8 sps:$4 sm:$0xff]  }
 0x109   : > { %1134 = vmatprep.subr.bf16.mxu0 %v3071_v12  ;;  %2907 = vmatprep.subr.bf16.mxu1 %v3196_v47  ;;  %v3133_v6 = vld [vmem:[#allocation7 + $0x1a0] ss:$8 sps:$4 sm:$0xff]   ;;  %v3138_v7 = vld [vmem:[#allocation7 + $0x1b4] ss:$8 sps:$4 sm:$0xff]   ;;  %v3136_v8 = vld [vmem:[#allocation7 + $0x1b0] ss:$8 sps:$4 sm:$0xff]  }
 0x10a   : > { %v3141_v9 = vld [vmem:[#allocation7 + $0x1c4] ss:$8 sps:$4 sm:$0xff]   ;;  %v3139_v10 = vld [vmem:[#allocation7 + $0x1c0] ss:$8 sps:$4 sm:$0xff]   ;;  %v3144_v11 = vld [vmem:[#allocation7 + $0x1d4] ss:$8 sps:$4 sm:$0xff]  }
 0x10b   : > { %v3142_v12 = vld [vmem:[#allocation7 + $0x1d0] ss:$8 sps:$4 sm:$0xff]   ;;  %v3147_v13 = vld [vmem:[#allocation7 + $0x1e4] ss:$8 sps:$4 sm:$0xff]   ;;  %v3145_v14 = vld [vmem:[#allocation7 + $0x1e0] ss:$8 sps:$4 sm:$0xff]  }
 0x10c   : > { %1135 = vmatpush1.bf16.msra.mxu0 %v3073_v15  ;;  %2908 = vmatpush3.bf16.msra.mxu1 %v3197_v51  ;;  %v3150_v15 = vld [vmem:[#allocation7 + $0x1f4] ss:$8 sps:$4 sm:$0xff]   ;;  %v3179_v36 = vld [vmem:[#allocation7 + $0x284] ss:$8 sps:$4 sm:$0xff]   ;;  %v3177_v37 = vld [vmem:[#allocation7 + $0x280] ss:$8 sps:$4 sm:$0xff]  }
 0x10d   : > { %1136 = vmatprep.subr.bf16.mxu0 %v3074_v16  ;;  %2909 = vmatprep.subr.bf16.mxu1 %v3198_v52  ;;  %v3148_v16 = vld [vmem:[#allocation7 + $0x1f0] ss:$8 sps:$4 sm:$0xff]   ;;  %v3185_v44 = vld [vmem:[#allocation7 + $0x2a4] ss:$8 sps:$4 sm:$0xff]   ;;  %v3183_v47 = vld [vmem:[#allocation7 + $0x2a0] ss:$8 sps:$4 sm:$0xff]  }
 0x10e   : > { %v3202_v52 = vld [vmem:[#allocation8 + $0x70] sm:$0xff]   ;;  %s3601_s8 = scalar_lea.vmem %s3600_s10, 256 }
 0x110   : > { %1137 = vmatpush1.bf16.msra.mxu0 %v3076_v17  ;;  %2910 = vmatpush3.bf16.msra.mxu1 %v3199_v53  ;;  %v3155_v17 = vld [vmem:[#allocation7 + $0x204] ss:$8 sps:$4 sm:$0xff]  }
 0x111   : > { %1138 = vmatprep.subr.bf16.mxu0 %v3077_v18  ;;  %2911 = vmatprep.subr.bf16.mxu1 %v3200_v55  ;;  %v553_v18 = vld [vmem:[%s4065_s30 + $0x10] sm:$0xff]  ;;  %s2453_s30 = sshll.u32 %s4144_s11, 4  ;;  %s2454_s30 = int_to_ptr.vmem [resolvable:$true] %s2453_s30 }
 0x112   : > { %v2663_v51 = vcombine.low %v553_v18, %v553_v18  ;;  %v3203_v53 = vld [vmem:[#allocation8 + $0x30] sm:$0xff]   ;;  %v3205_v55 = vld [vmem:[#allocation8 + $0x38] sm:$0xff]   ;;  %s3595_s18 = scalar_lea.vmem %s2454_s30, 128  ;;  %p3602_p0 = scmp.lt.s32.totalorder %s2454_s30, %s3600_s10 }
 0x113   : > { %p3596_p12 = scmp.ne.s32.totalorder %s2454_s30, %s3595_s18  ;;  %p3603_p5 = scmp.lt.s32.totalorder %s3601_s8, %s3595_s18 }
 0x114   : > { %1139 = vmatpush1.bf16.msra.mxu0 %v3079_v19  ;;  %2912 = vmatpush3.bf16.msra.mxu1 %v3201_v57  ;;  %v2661_v19 = vcombine.low %v4095_v35, %v4095_v35  ;;  %v3174_v35 = vld [vmem:[#allocation7 + $0x270] ss:$8 sps:$4 sm:$0xff]  }
 0x115   : > { %1140 = vmatprep.subr.bf16.mxu0 %v3080_v20  ;;  %v3153_v20 = vld [vmem:[#allocation7 + $0x200] ss:$8 sps:$4 sm:$0xff]   ;;  %2913 = vmatprep.subr.bf16.mxu1 %v3202_v52  ;;  %p3597_p6 = pnand %p3596_p12, %p4289_p13  ;;  %p3604_p3 = por %p3603_p5, %p3602_p0 }
 0x116   : > { %1491 = vrot.lane.b32.xlu0 %v2663_v51, %s3725_s20  ;;  %v1488_v52 = vld [vmem:[#allocation11 + $0x130] sm:$0x33] }
 0x117   : > { %p3598_p9 = pneg %p3597_p6 }
 0x118   : > { %1141 = vmatpush1.bf16.msra.mxu0 %v3082_v21  ;;  %v4105_v21 = vcombine.high %v553_v18, %v553_v18  ;;  %2914 = vmatpush3.bf16.msra.mxu1 %v3203_v53  ;;  %v3260_v53 = vld [vmem:[#allocation11 + $0x120] ss:$8 sps:$4 sm:$0xff]  }
 0x119   : > { %1142 = vmatprep.subr.bf16.mxu0 %v3083_v22  ;;  %v3158_v22 = vld [vmem:[#allocation7 + $0x214] ss:$8 sps:$4 sm:$0xff]   ;;  %p3605_p2 = pnand %p3604_p3, %p3598_p9 }
 0x11a   : > { %1493 = vrot.lane.b32.xlu0 %v4105_v21, %s3725_s20  ;;  %s2435_s20 = scalar_lea.sflag [#allocation4], %s4061_s6 }
 0x11c   : > { %1143 = vmatpush1.bf16.msra.mxu0 %v3085_v23  ;;  %v3156_v23 = vld [vmem:[#allocation7 + $0x210] ss:$8 sps:$4 sm:$0xff]  }
 0x11d   : > { %1144 = vmatprep.subr.bf16.mxu0 %v3086_v24  ;;  %v3161_v24 = vld [vmem:[#allocation7 + $0x224] ss:$8 sps:$4 sm:$0xff]  }
 0x120   : > { %1145 = vmatpush1.bf16.msra.mxu0 %v3088_v25  ;;  %v3159_v25 = vld [vmem:[#allocation7 + $0x220] ss:$8 sps:$4 sm:$0xff]  }
 0x121   : > { %1146 = vmatprep.subr.bf16.mxu0 %v3089_v26  ;;  %v3164_v26 = vld [vmem:[#allocation7 + $0x234] ss:$8 sps:$4 sm:$0xff]  }
 0x124   : > { %1147 = vmatpush1.bf16.msra.mxu0 %v3091_v27  ;;  %v3162_v27 = vld [vmem:[#allocation7 + $0x230] ss:$8 sps:$4 sm:$0xff]  }
 0x125   : > { %1148 = vmatprep.subr.bf16.mxu0 %v3092_v28  ;;  %v3167_v28 = vld [vmem:[#allocation7 + $0x244] ss:$8 sps:$4 sm:$0xff]  }
 0x128   : > { %1149 = vmatpush1.bf16.msra.mxu0 %v3094_v29  ;;  %v3165_v29 = vld [vmem:[#allocation7 + $0x240] ss:$8 sps:$4 sm:$0xff]  }
 0x129   : > { %1150 = vmatprep.subr.bf16.mxu0 %v3095_v30  ;;  %v3170_v30 = vld [vmem:[#allocation7 + $0x254] ss:$8 sps:$4 sm:$0xff]  }
 0x12c   : > { %1151 = vmatpush1.bf16.msra.mxu0 %v3097_v31  ;;  %v3168_v31 = vld [vmem:[#allocation7 + $0x250] ss:$8 sps:$4 sm:$0xff]  }
 0x12d   : > { %1152 = vmatprep.subr.bf16.mxu0 %v3098_v32  ;;  %v3173_v32 = vld [vmem:[#allocation7 + $0x264] ss:$8 sps:$4 sm:$0xff]  }
 0x130   : > { %1153 = vmatpush1.bf16.msra.mxu0 %v3100_v33  ;;  %v3171_v33 = vld [vmem:[#allocation7 + $0x260] ss:$8 sps:$4 sm:$0xff]  }
 0x131   : > { %1163 = vmatprep.subr.bf16.mxu0 %v3105_v34  ;;  %v3176_v34 = vld [vmem:[#allocation7 + $0x274] ss:$8 sps:$4 sm:$0xff]  }
 0x133   : > { %1155 = vmatmul.mubr.bf16.vlgmr.msra.gmra.mrb[0].mxu0 %v2659_v40  ;;  %v3724_v40 = vmov 65535  }
 0x134   : > { %1164 = vmatpush1.bf16.msra.mxu0 %v3103_v38  ;;  %1195 = vmatprep.mubr.bf16.mxu0 %v4099_v43  ;;  %v3182_v38 = vld [vmem:[#allocation7 + $0x294] ss:$8 sps:$4 sm:$0xff]   ;;  %v1114_v41 = vsel %vm1112_vm1, 4294967295, %v3724_v40  ;;  %v3248_v40 = vld [vmem:[#allocation11 + $0xe0] ss:$8 sps:$4 sm:$0xff]  }
 0x135   : > { %1165 = vmatprep.subr.bf16.mxu0 %v3108_v42  ;;  %v3180_v42 = vld [vmem:[#allocation7 + $0x290] ss:$8 sps:$4 sm:$0xff]   ;;  %v1115_v46 = vsel %vm1113_vm2, %v1114_v41, 0  ;;  %v3253_v41 = vld [vmem:[#allocation11 + $0xf4] ss:$8 sps:$4 sm:$0xff]  }
 0x138   : > { %1166 = vmatpush1.bf16.msra.mxu0 %v3106_v45  ;;  %v2752_v45 = vcombine.high %v640_v39, %v640_v39 }
 0x139   : > { %1167 = vmatprep.subr.bf16.mxu0 %v3111_v48  ;;  %v2751_v48 = vcombine.low %v640_v39, %v640_v39  ;;  %v3250_v39 = vld [vmem:[#allocation11 + $0xe4] ss:$8 sps:$4 sm:$0xff]  }
 0x13c   : > { %1168 = vmatpush1.bf16.msra.mxu0 %v3109_v49  ;;  %v1120_v49 = vand.u32 %v2752_v45, %v1115_v46  ;;  %v3256_v45 = vld [vmem:[#allocation11 + $0x104] ss:$8 sps:$4 sm:$0xff]  }
 0x13d   : > { %1169 = vmatprep.subr.bf16.mxu0 %v3114_v50  ;;  %v1117_v50 = vand.u32 %v2751_v48, %v1115_v46  ;;  %v3259_v48 = vld [vmem:[#allocation11 + $0x114] ss:$8 sps:$4 sm:$0xff]  }
 0x140   : > { %1170 = vmatpush1.bf16.msra.mxu0 %v3112_v54  ;;  %v3204_v54 = vld [vmem:[#allocation8 + $0x78] sm:$0xff]  }
 0x141   : > { %1171 = vmatprep.subr.bf16.mxu0 %v3117_v56  ;;  %2915 = vmatprep.subr.bf16.mxu1 %v3204_v54  ;;  %v643_v56 = vlaneseq  ;;  %v2810_v54 = vcombine.high %v1488_v52, %v1488_v52 }
 0x142   : > { %2916 = vmatpush3.bf16.msra.mxu1 %v3205_v55  ;;  %v2809_v55 = vcombine.low %v1488_v52, %v1488_v52 }
 0x143   : > { %v4111_v57 = vshrl.u32 %v643_v56, 7 }
 0x144   : > { %1172 = vmatpush1.bf16.msra.mxu0 %v3115_v58  ;;  %v1700_v56 = vsel %vm1112_vm1, %v2809_v55, 0  ;;  %v3289_v55 = vld [vmem:[#allocation13] ss:$16 sps:$4 sm:$0xff]  }
 0x145   : > { %1173 = vmatprep.subr.bf16.mxu0 %v3120_v59  ;;  %v4114_v58 = vsub.s32 0, %v4111_v57  ;;  %v641_v59 = vld [vmem:[%s4239_s3] sm:$0x3] }
 0x148   : > { %1174 = vmatpush1.bf16.msra.mxu0 %v3118_v60  ;;  %v4120_v60 = vsub.s32 1, %v4111_v57 }
 0x149   : > { %1175 = vmatprep.subr.bf16.mxu0 %v3123_v61  ;;  %v646_v61 = vrot.slane %v641_v59, %v4114_v58 }
 0x14c   : > { %1176 = vmatpush1.bf16.msra.mxu0 %v3121_v62  ;;  %v650_v62 = vrot.slane %v641_v59, %v4120_v60  ;;  %v3267_v59 = vld [vmem:[#allocation10 + $0x4] ss:$8 sps:$4 sm:$0xff]  }
 0x14d   : > { %1177 = vmatprep.subr.bf16.mxu0 %v3126_v63 }
 0x150   : > { %1178 = vmatpush1.bf16.msra.mxu0 %v3124_v0 }
 0x151   : > { %1179 = vmatprep.subr.bf16.mxu0 %v3129_v1 }
 0x154   : > { %1180 = vmatpush1.bf16.msra.mxu0 %v3127_v2 }
 0x155   : > { %1181 = vmatprep.subr.bf16.mxu0 %v3132_v3 }
 0x158   : > { %1182 = vmatpush1.bf16.msra.mxu0 %v3130_v4 }
 0x159   : > { %1183 = vmatprep.subr.bf16.mxu0 %v3135_v5 }
 0x15c   : > { %1184 = vmatpush1.bf16.msra.mxu0 %v3133_v6 }
 0x15d   : > { %1185 = vmatprep.subr.bf16.mxu0 %v3138_v7 }
 0x160   : > { %1186 = vmatpush1.bf16.msra.mxu0 %v3136_v8  ;;  %v3206_v8 = vld [vmem:[#allocation11] ss:$8 sps:$4 sm:$0xff]  }
 0x161   : > { %1187 = vmatprep.subr.bf16.mxu0 %v3141_v9  ;;  %v3208_v9 = vld [vmem:[#allocation11 + $0x4] ss:$8 sps:$4 sm:$0xff]  }
 0x162   : > { %1705 = vmatprep.subr.bf16.mxu1 %v3208_v9  ;;  %v2754_v9 = vld [vmem:[%s4241_s5] ss:$0 sm:$0xff] }
 0x164   : > { %1188 = vmatpush1.bf16.msra.mxu0 %v3139_v10  ;;  %v3211_v10 = vld [vmem:[#allocation11 + $0x14] ss:$8 sps:$4 sm:$0xff]  }
 0x165   : > { %1189 = vmatprep.subr.bf16.mxu0 %v3144_v11 }
 0x168   : > { %1190 = vmatpush1.bf16.msra.mxu0 %v3142_v12  ;;  %v3209_v12 = vld [vmem:[#allocation11 + $0x10] ss:$8 sps:$4 sm:$0xff]  }
 0x169   : > { %1191 = vmatprep.subr.bf16.mxu0 %v3147_v13  ;;  %v3214_v13 = vld [vmem:[#allocation11 + $0x24] ss:$8 sps:$4 sm:$0xff]  }
 0x16c   : > { %1192 = vmatpush1.bf16.msra.mxu0 %v3145_v14  ;;  %v3212_v14 = vld [vmem:[#allocation11 + $0x20] ss:$8 sps:$4 sm:$0xff]  }
 0x16d   : > { %1193 = vmatprep.subr.bf16.mxu0 %v3150_v15  ;;  %v3217_v15 = vld [vmem:[#allocation11 + $0x34] ss:$8 sps:$4 sm:$0xff]  }
 0x170   : > { %1194 = vmatpush1.bf16.msra.mxu0 %v3148_v16 }
 0x171   : > { %1204 = vmatprep.subr.bf16.mxu0 %v3155_v17  ;;  %v3215_v17 = vld [vmem:[#allocation11 + $0x30] ss:$8 sps:$4 sm:$0xff]  }
 0x173   : > { %1196 = vmatmul.mubr.bf16.vlgmr.msra.gmra.mrb[0].mxu0 %v2661_v19  ;;  %v3220_v19 = vld [vmem:[#allocation11 + $0x44] ss:$8 sps:$4 sm:$0xff]  }
 0x174   : > { %1205 = vmatpush1.bf16.msra.mxu0 %v3153_v20  ;;  %2753 = vmatprep.mubr.msk.bf16.mxu0 %vm1108_vm0, %v4105_v21  ;;  %v3218_v20 = vld [vmem:[#allocation11 + $0x40] ss:$8 sps:$4 sm:$0xff]   ;;  %v3223_v21 = vld [vmem:[#allocation11 + $0x54] ss:$8 sps:$4 sm:$0xff]  }
 0x175   : > { %1206 = vmatprep.subr.bf16.mxu0 %v3158_v22  ;;  %v3221_v22 = vld [vmem:[#allocation11 + $0x50] ss:$8 sps:$4 sm:$0xff]  }
 0x178   : > { %1207 = vmatpush1.bf16.msra.mxu0 %v3156_v23  ;;  %v3226_v23 = vld [vmem:[#allocation11 + $0x64] ss:$8 sps:$4 sm:$0xff]  }
 0x179   : > { %1208 = vmatprep.subr.bf16.mxu0 %v3161_v24  ;;  %v3224_v24 = vld [vmem:[#allocation11 + $0x60] ss:$8 sps:$4 sm:$0xff]  }
 0x17c   : > { %1209 = vmatpush1.bf16.msra.mxu0 %v3159_v25  ;;  %v3229_v25 = vld [vmem:[#allocation11 + $0x74] ss:$8 sps:$4 sm:$0xff]  }
 0x17d   : > { %1210 = vmatprep.subr.bf16.mxu0 %v3164_v26  ;;  %v3227_v26 = vld [vmem:[#allocation11 + $0x70] ss:$8 sps:$4 sm:$0xff]  }
 0x180   : > { %1211 = vmatpush1.bf16.msra.mxu0 %v3162_v27  ;;  %v3232_v27 = vld [vmem:[#allocation11 + $0x84] ss:$8 sps:$4 sm:$0xff]  }
 0x181   : > { %1212 = vmatprep.subr.bf16.mxu0 %v3167_v28  ;;  %v3230_v28 = vld [vmem:[#allocation11 + $0x80] ss:$8 sps:$4 sm:$0xff]  }
 0x184   : > { %1213 = vmatpush1.bf16.msra.mxu0 %v3165_v29  ;;  %v3235_v29 = vld [vmem:[#allocation11 + $0x94] ss:$8 sps:$4 sm:$0xff]  }
 0x185   : > { %1214 = vmatprep.subr.bf16.mxu0 %v3170_v30  ;;  %v3233_v30 = vld [vmem:[#allocation11 + $0x90] ss:$8 sps:$4 sm:$0xff]  }
 0x188   : > { %1215 = vmatpush1.bf16.msra.mxu0 %v3168_v31  ;;  %v4124_v11 = vpop.permute.xlu0 %1491  ;;  %v3238_v31 = vld [vmem:[#allocation11 + $0xa4] ss:$8 sps:$4 sm:$0xff]  }
 0x189   : > { %1216 = vmatprep.subr.bf16.mxu0 %v3173_v32  ;;  %v3236_v32 = vld [vmem:[#allocation11 + $0xa0] ss:$8 sps:$4 sm:$0xff]  }
 0x18c   : > { %1217 = vmatpush1.bf16.msra.mxu0 %v3171_v33  ;;  %v4126_v16 = vpop.permute.xlu0 %1493  ;;  %v3241_v33 = vld [vmem:[#allocation11 + $0xb4] ss:$8 sps:$4 sm:$0xff]  }
 0x18d   : > { %1218 = vmatprep.subr.bf16.mxu0 %v3176_v34  ;;  %v1497_v18 = vsel %vm1495_vm3, %v4124_v11, %v4126_v16  ;;  %v3239_v34 = vld [vmem:[#allocation11 + $0xb0] ss:$8 sps:$4 sm:$0xff]  }
 0x190   : > { %1219 = vmatpush1.bf16.msra.mxu0 %v3174_v35  ;;  %v3244_v35 = vld [vmem:[#allocation11 + $0xc4] ss:$8 sps:$4 sm:$0xff]  }
 0x191   : > { %1220 = vmatprep.subr.bf16.mxu0 %v3179_v36  ;;  %v3242_v36 = vld [vmem:[#allocation11 + $0xc0] ss:$8 sps:$4 sm:$0xff]  }
 0x194   : > { %1221 = vmatpush1.bf16.msra.mxu0 %v3177_v37  ;;  %v3247_v37 = vld [vmem:[#allocation11 + $0xd4] ss:$8 sps:$4 sm:$0xff]  }
 0x195   : > { %1222 = vmatprep.subr.bf16.mxu0 %v3182_v38  ;;  %v3245_v38 = vld [vmem:[#allocation11 + $0xd0] ss:$8 sps:$4 sm:$0xff]  }
 0x198   : > { %1223 = vmatpush1.bf16.msra.mxu0 %v3180_v42  ;;  %v3251_v42 = vld [vmem:[#allocation11 + $0xf0] ss:$8 sps:$4 sm:$0xff]  }
 0x199   : > { %1224 = vmatprep.subr.bf16.mxu0 %v3185_v44  ;;  %v1490_v44 = vpop.permute.xlu1 %1489 }
 0x19a   : > { %v1496_v46 = vsel %vm1495_vm3, %v1490_v44, %v4124_v11  ;;  %v3366_v44 = vld [vmem:[#allocation13 + $0x18c] ss:$16 sps:$4 sm:$0xff]  }
 0x19c   : > { %1225 = vmatpush1.bf16.msra.mxu0 %v3183_v47  ;;  %v3254_v47 = vld [vmem:[#allocation11 + $0x100] ss:$8 sps:$4 sm:$0xff]  }
 0x19d   : > { %1226 = vmatprep.subr.bf16.mxu0 %v1120_v49  ;;  %v3257_v49 = vld [vmem:[#allocation11 + $0x110] ss:$8 sps:$4 sm:$0xff]  }
 0x1a0   : > { %1227 = vmatpush1.bf16.msra.mxu0 %v1117_v50  ;;  %v3726_v50 = vmov 0  }
 0x1a3   : > { %1237 = vmatmul.mubr.bf16.vlgmr.msra.gmra.mrb[0].mxu0 %v2663_v51  ;;  %v3262_v51 = vld [vmem:[#allocation11 + $0x124] ss:$8 sps:$4 sm:$0xff]  }
 0x276   : > { %v1238_v43 = vpop.f32.mrb[0].mxu0 }
 0x277   : > { %v2923_v63 = vadd.f32 %v1238_v43, %v646_v61  ;;  %v1240_v0 = vpop.f32.mrb[1].mxu0  ;;  %v3265_v61 = vld [vmem:[#allocation10] ss:$8 sps:$4 sm:$0xff]   ;;  %v3268_v43 = vld [vmem:[#allocation10 + $0x10] ss:$8 sps:$4 sm:$0xff]  }
 0x278   : > { %v2924_v1 = vadd.f32 %v1240_v0, %v650_v62  ;;  %v1242_v2 = vpop.f32.mrb[2].mxu0  ;;  %v3270_v62 = vld [vmem:[#allocation10 + $0x14] ss:$8 sps:$4 sm:$0xff]   ;;  %v3271_v0 = vld [vmem:[#allocation10 + $0x20] ss:$8 sps:$4 sm:$0xff]  }
 0x279   : > { %v1245_v3 = vmax.f32 %v2923_v63, 0.0  ;;  %v1243_v4 = vpop.f32.mrb[3].mxu0  ;;  %v3273_v63 = vld [vmem:[#allocation10 + $0x24] ss:$8 sps:$4 sm:$0xff]   ;;  %v3274_v2 = vld [vmem:[#allocation10 + $0x30] ss:$8 sps:$4 sm:$0xff]  }
 0x27a   : > { %v1246_v5 = vmax.f32 %v2924_v1, 0.0  ;;  %v3276_v1 = vld [vmem:[#allocation10 + $0x34] ss:$8 sps:$4 sm:$0xff]   ;;  %v3277_v4 = vld [vmem:[#allocation10 + $0x40] ss:$8 sps:$4 sm:$0xff]  }
 0x27b   : > { %v1247_v7 = vpack.c.bf16 %v1245_v3, %v1245_v3  ;;  %v3279_v3 = vld [vmem:[#allocation10 + $0x44] ss:$8 sps:$4 sm:$0xff]  }
 0x27c   : > { %v1248_v6 = vpack.c.bf16 %v1246_v5, %v1246_v5  ;;  %v3282_v5 = vld [vmem:[#allocation10 + $0x54] ss:$8 sps:$4 sm:$0xff]  }
 0x27e   : > { %1416 = vmatprep.mubr.bf16.mxu1 %v1248_v6  ;;  %v3280_v6 = vld [vmem:[#allocation10 + $0x50] ss:$8 sps:$4 sm:$0xff]  }
 0x27f   : > { %1417 = vmatmul.mubr.bf16.vlgmr.msra.gmra.mrb[0].mxu1 %v1247_v7 }
 0x280   : > { %1706 = vmatpush1.bf16.msra.mxu1 %v3206_v8  ;;  %1737 = vmatprep.mubr.bf16.mxu1 %v1497_v18  ;;  %v3285_v8 = vld [vmem:[#allocation10 + $0x64] ss:$8 sps:$4 sm:$0xff]  }
 0x281   : > { %1707 = vmatprep.subr.bf16.mxu1 %v3211_v10  ;;  %v3291_v18 = vld [vmem:[#allocation13 + $0x4] ss:$16 sps:$4 sm:$0xff]  }
 0x284   : > { %1708 = vmatpush1.bf16.msra.mxu1 %v3209_v12 }
 0x285   : > { %1709 = vmatprep.subr.bf16.mxu1 %v3214_v13 }
 0x288   : > { %1710 = vmatpush1.bf16.msra.mxu1 %v3212_v14  ;;  %v3283_v14 = vld [vmem:[#allocation10 + $0x60] ss:$8 sps:$4 sm:$0xff]  }
 0x289   : > { %1711 = vmatprep.subr.bf16.mxu1 %v3217_v15 }
 0x28c   : > { %1712 = vmatpush1.bf16.msra.mxu1 %v3215_v17  ;;  %v3286_v17 = vld [vmem:[#allocation10 + $0x70] ss:$8 sps:$4 sm:$0xff]  }
 0x28d   : > { %1713 = vmatprep.subr.bf16.mxu1 %v3220_v19  ;;  %v3292_v19 = vld [vmem:[#allocation13 + $0x8] ss:$16 sps:$4 sm:$0xff]  }
 0x290   : > { %1714 = vmatpush1.bf16.msra.mxu1 %v3218_v20  ;;  %v3294_v20 = vld [vmem:[#allocation13 + $0xc] ss:$16 sps:$4 sm:$0xff]  }
 0x291   : > { %1715 = vmatprep.subr.bf16.mxu1 %v3223_v21  ;;  %2373 = vmatprep.subr.bf16.mxu0 %v3294_v20  ;;  %v3300_v21 = vld [vmem:[#allocation13 + $0x2c] ss:$16 sps:$4 sm:$0xff]  }
 0x292   : > { %2374 = vmatpush1.bf16.msra.mxu0 %v3292_v19 }
 0x293   : > { %2375 = vmatprep.subr.bf16.mxu0 %v3300_v21 }
 0x294   : > { %1716 = vmatpush1.bf16.msra.mxu1 %v3221_v22  ;;  %v3298_v22 = vld [vmem:[#allocation13 + $0x28] ss:$16 sps:$4 sm:$0xff]  }
 0x295   : > { %1717 = vmatprep.subr.bf16.mxu1 %v3226_v23  ;;  %v3306_v23 = vld [vmem:[#allocation13 + $0x4c] ss:$16 sps:$4 sm:$0xff]  }
 0x296   : > { %2376 = vmatpush1.bf16.msra.mxu0 %v3298_v22  ;;  %v3343_v22 = vld [vmem:[#allocation13 + $0x120] ss:$16 sps:$4 sm:$0xff]  }
 0x297   : > { %2377 = vmatprep.subr.bf16.mxu0 %v3306_v23  ;;  %v3351_v23 = vld [vmem:[#allocation13 + $0x144] ss:$16 sps:$4 sm:$0xff]  }
 0x298   : > { %1718 = vmatpush1.bf16.msra.mxu1 %v3224_v24  ;;  %v3304_v24 = vld [vmem:[#allocation13 + $0x48] ss:$16 sps:$4 sm:$0xff]  }
 0x299   : > { %1719 = vmatprep.subr.bf16.mxu1 %v3229_v25  ;;  %v3312_v25 = vld [vmem:[#allocation13 + $0x6c] ss:$16 sps:$4 sm:$0xff]  }
 0x29a   : > { %2378 = vmatpush1.bf16.msra.mxu0 %v3304_v24  ;;  %v3349_v24 = vld [vmem:[#allocation13 + $0x140] ss:$16 sps:$4 sm:$0xff]  }
 0x29b   : > { %2379 = vmatprep.subr.bf16.mxu0 %v3312_v25  ;;  %v3357_v25 = vld [vmem:[#allocation13 + $0x164] ss:$16 sps:$4 sm:$0xff]  }
 0x29c   : > { %1720 = vmatpush1.bf16.msra.mxu1 %v3227_v26  ;;  %v3310_v26 = vld [vmem:[#allocation13 + $0x68] ss:$16 sps:$4 sm:$0xff]  }
 0x29d   : > { %1721 = vmatprep.subr.bf16.mxu1 %v3232_v27  ;;  %v3318_v27 = vld [vmem:[#allocation13 + $0x8c] ss:$16 sps:$4 sm:$0xff]  }
 0x29e   : > { %2380 = vmatpush1.bf16.msra.mxu0 %v3310_v26  ;;  %v3355_v26 = vld [vmem:[#allocation13 + $0x160] ss:$16 sps:$4 sm:$0xff]  }
 0x29f   : > { %2381 = vmatprep.subr.bf16.mxu0 %v3318_v27  ;;  %v3363_v27 = vld [vmem:[#allocation13 + $0x184] ss:$16 sps:$4 sm:$0xff]  }
 0x2a0   : > { %1722 = vmatpush1.bf16.msra.mxu1 %v3230_v28  ;;  %v3316_v28 = vld [vmem:[#allocation13 + $0x88] ss:$16 sps:$4 sm:$0xff]  }
 0x2a1   : > { %1723 = vmatprep.subr.bf16.mxu1 %v3235_v29  ;;  %v3324_v29 = vld [vmem:[#allocation13 + $0xac] ss:$16 sps:$4 sm:$0xff]  }
 0x2a2   : > { %2382 = vmatpush1.bf16.msra.mxu0 %v3316_v28  ;;  %v3361_v28 = vld [vmem:[#allocation13 + $0x180] ss:$16 sps:$4 sm:$0xff]  }
 0x2a3   : > { %2383 = vmatprep.subr.bf16.mxu0 %v3324_v29  ;;  %v3369_v29 = vld [vmem:[#allocation13 + $0x1a4] ss:$16 sps:$4 sm:$0xff]  }
 0x2a4   : > { %1724 = vmatpush1.bf16.msra.mxu1 %v3233_v30  ;;  %v3322_v30 = vld [vmem:[#allocation13 + $0xa8] ss:$16 sps:$4 sm:$0xff]  }
 0x2a5   : > { %1725 = vmatprep.subr.bf16.mxu1 %v3238_v31  ;;  %v3330_v31 = vld [vmem:[#allocation13 + $0xcc] ss:$16 sps:$4 sm:$0xff]  }
 0x2a6   : > { %2384 = vmatpush1.bf16.msra.mxu0 %v3322_v30  ;;  %v3367_v30 = vld [vmem:[#allocation13 + $0x1a0] ss:$16 sps:$4 sm:$0xff]  }
 0x2a7   : > { %2385 = vmatprep.subr.bf16.mxu0 %v3330_v31  ;;  %v3375_v31 = vld [vmem:[#allocation13 + $0x1c4] ss:$16 sps:$4 sm:$0xff]  }
 0x2a8   : > { %1726 = vmatpush1.bf16.msra.mxu1 %v3236_v32  ;;  %v3328_v32 = vld [vmem:[#allocation13 + $0xc8] ss:$16 sps:$4 sm:$0xff]  }
 0x2a9   : > { %1727 = vmatprep.subr.bf16.mxu1 %v3241_v33  ;;  %v3336_v33 = vld [vmem:[#allocation13 + $0xec] ss:$16 sps:$4 sm:$0xff]  }
 0x2aa   : > { %2386 = vmatpush1.bf16.msra.mxu0 %v3328_v32  ;;  %v3378_v32 = vld [vmem:[#allocation13 + $0x1cc] ss:$16 sps:$4 sm:$0xff]  }
 0x2ab   : > { %2387 = vmatprep.subr.bf16.mxu0 %v3336_v33  ;;  %v3373_v33 = vld [vmem:[#allocation13 + $0x1c0] ss:$16 sps:$4 sm:$0xff]  }
 0x2ac   : > { %1728 = vmatpush1.bf16.msra.mxu1 %v3239_v34  ;;  %v3334_v34 = vld [vmem:[#allocation13 + $0xe8] ss:$16 sps:$4 sm:$0xff]  }
 0x2ad   : > { %1729 = vmatprep.subr.bf16.mxu1 %v3244_v35  ;;  %v3342_v35 = vld [vmem:[#allocation13 + $0x10c] ss:$16 sps:$4 sm:$0xff]  }
 0x2ae   : > { %2388 = vmatpush1.bf16.msra.mxu0 %v3334_v34  ;;  %v3376_v34 = vld [vmem:[#allocation13 + $0x1c8] ss:$16 sps:$4 sm:$0xff]  }
 0x2af   : > { %2389 = vmatprep.subr.bf16.mxu0 %v3342_v35  ;;  %v3381_v35 = vld [vmem:[#allocation13 + $0x1e4] ss:$16 sps:$4 sm:$0xff]  }
 0x2b0   : > { %1730 = vmatpush1.bf16.msra.mxu1 %v3242_v36  ;;  %v3340_v36 = vld [vmem:[#allocation13 + $0x108] ss:$16 sps:$4 sm:$0xff]  }
 0x2b1   : > { %1731 = vmatprep.subr.bf16.mxu1 %v3247_v37  ;;  %v3348_v37 = vld [vmem:[#allocation13 + $0x12c] ss:$16 sps:$4 sm:$0xff]  }
 0x2b2   : > { %2390 = vmatpush1.bf16.msra.mxu0 %v3340_v36  ;;  %v3384_v36 = vld [vmem:[#allocation13 + $0x1ec] ss:$16 sps:$4 sm:$0xff]  }
 0x2b3   : > { %2391 = vmatprep.subr.bf16.mxu0 %v3348_v37  ;;  %v3379_v37 = vld [vmem:[#allocation13 + $0x1e0] ss:$16 sps:$4 sm:$0xff]  }
 0x2b4   : > { %1732 = vmatpush1.bf16.msra.mxu1 %v3245_v38  ;;  %v3346_v38 = vld [vmem:[#allocation13 + $0x128] ss:$16 sps:$4 sm:$0xff]  }
 0x2b5   : > { %1733 = vmatprep.subr.bf16.mxu1 %v3250_v39  ;;  %v3354_v39 = vld [vmem:[#allocation13 + $0x14c] ss:$16 sps:$4 sm:$0xff]  }
 0x2b6   : > { %2392 = vmatpush1.bf16.msra.mxu0 %v3346_v38  ;;  %v3382_v38 = vld [vmem:[#allocation13 + $0x1e8] ss:$16 sps:$4 sm:$0xff]  }
 0x2b7   : > { %2393 = vmatprep.subr.bf16.mxu0 %v3354_v39  ;;  %v1908_v39 = vld [vmem:[%s4287_s4] sm:$0x3] }
 0x2b8   : > { %1734 = vmatpush1.bf16.msra.mxu1 %v3248_v40  ;;  %v3352_v40 = vld [vmem:[#allocation13 + $0x148] ss:$16 sps:$4 sm:$0xff]  }
 0x2b9   : > { %1735 = vmatprep.subr.bf16.mxu1 %v3253_v41  ;;  %v3360_v41 = vld [vmem:[#allocation13 + $0x16c] ss:$16 sps:$4 sm:$0xff]  }
 0x2ba   : > { %2394 = vmatpush1.bf16.msra.mxu0 %v3352_v40  ;;  %v1913_v40 = vrot.slane %v1908_v39, %v4114_v58 }
 0x2bb   : > { %2395 = vmatprep.subr.bf16.mxu0 %v3360_v41 }
 0x2bc   : > { %1736 = vmatpush1.bf16.msra.mxu1 %v3251_v42  ;;  %v3358_v42 = vld [vmem:[#allocation13 + $0x168] ss:$16 sps:$4 sm:$0xff]  }
 0x2bd   : > { %1746 = vmatprep.subr.bf16.mxu1 %v3256_v45  ;;  %v3364_v45 = vld [vmem:[#allocation13 + $0x188] ss:$16 sps:$4 sm:$0xff]  }
 0x2be   : > { %2396 = vmatpush1.bf16.msra.mxu0 %v3358_v42  ;;  %v1917_v42 = vrot.slane %v1908_v39, %v4120_v60 }
 0x2bf   : > { %1738 = vmatmul.mubr.bf16.vlgmr.msra.gmra.mrb[4].mxu1 %v1496_v46  ;;  %2397 = vmatprep.subr.bf16.mxu0 %v3366_v44  ;;  %v3372_v46 = vld [vmem:[#allocation13 + $0x1ac] ss:$16 sps:$4 sm:$0xff]  }
 0x2c0   : > { %1747 = vmatpush1.bf16.msra.mxu1 %v3254_v47  ;;  %1778 = vmatprep.mubr.bf16.mxu1 %v3726_v50  ;;  %v3370_v47 = vld [vmem:[#allocation13 + $0x1a8] ss:$16 sps:$4 sm:$0xff]  }
 0x2c1   : > { %1748 = vmatprep.subr.bf16.mxu1 %v3259_v48 }
 0x2c2   : > { %2398 = vmatpush1.bf16.msra.mxu0 %v3364_v45 }
 0x2c3   : > { %2399 = vmatprep.subr.bf16.mxu0 %v3372_v46 }
 0x2c4   : > { %1749 = vmatpush1.bf16.msra.mxu1 %v3257_v49 }
 0x2c5   : > { %1750 = vmatprep.subr.bf16.mxu1 %v3262_v51  ;;  %v1427_v51 = vld [vmem:[%s4075_s12] sm:$0xff]  ;;  %s4160_s12 = scalar_lea.hbm %s4288_s26, %s2895_s29 }
 0x2c6   : > { %2400 = vmatpush1.bf16.msra.mxu0 %v3370_v47 }
 0x2c7   : > { %2401 = vmatprep.subr.bf16.mxu0 %v3378_v32 }
 0x2c8   : > { %1751 = vmatpush1.bf16.msra.mxu1 %v3260_v53 }
 0x2c9   : > { %2811 = vmatprep.subr.msk.bf16.mxu1 %vm1112_vm1, %v2810_v54 }
 0x2ca   : > { %2402 = vmatpush1.bf16.msra.mxu0 %v3376_v34 }
 0x2cb   : > { %2403 = vmatprep.subr.bf16.mxu0 %v3384_v36 }
 0x2cc   : > { %1753 = vmatpush1.bf16.msra.mxu1 %v1700_v56 }
 0x2cd   : > { %1867 = vmatprep.subr.bf16.mxu1 %v3267_v59  ;;  %v3297_v59 = vld [vmem:[#allocation13 + $0x24] ss:$16 sps:$4 sm:$0xff]  }
 0x2ce   : > { %2404 = vmatpush1.bf16.msra.mxu0 %v3382_v38 }
 0x2cf   : > { %2812 = vmatmul.mubr.msk.bf16.vlgmr.msra.gmra.mrb[8].mxu1 %vm1695_vm4, %v4126_v16  ;;  %v3288_v16 = vld [vmem:[#allocation10 + $0x74] ss:$8 sps:$4 sm:$0xff]  }
 0x2d0   : > { %1868 = vmatpush1.bf16.msra.mxu1 %v3265_v61  ;;  %1899 = vmatprep.mubr.bf16.mxu1 %v3726_v50  ;;  %v3295_v61 = vld [vmem:[#allocation13 + $0x20] ss:$16 sps:$4 sm:$0xff]  }
 0x2d1   : > { %1869 = vmatprep.subr.bf16.mxu1 %v3270_v62  ;;  %v3303_v62 = vld [vmem:[#allocation13 + $0x44] ss:$16 sps:$4 sm:$0xff]  }
 0x2d4   : > { %1870 = vmatpush1.bf16.msra.mxu1 %v3268_v43  ;;  %v3301_v43 = vld [vmem:[#allocation13 + $0x40] ss:$16 sps:$4 sm:$0xff]  }
 0x2d5   : > { %1871 = vmatprep.subr.bf16.mxu1 %v3273_v63  ;;  %v3309_v63 = vld [vmem:[#allocation13 + $0x64] ss:$16 sps:$4 sm:$0xff]  }
 0x2d8   : > { %1872 = vmatpush1.bf16.msra.mxu1 %v3271_v0  ;;  %v3307_v0 = vld [vmem:[#allocation13 + $0x60] ss:$16 sps:$4 sm:$0xff]  }
 0x2d9   : > { %1873 = vmatprep.subr.bf16.mxu1 %v3276_v1  ;;  %v3315_v1 = vld [vmem:[#allocation13 + $0x84] ss:$16 sps:$4 sm:$0xff]  }
 0x2dc   : > { %1874 = vmatpush1.bf16.msra.mxu1 %v3274_v2 }
 0x2dd   : > { %1875 = vmatprep.subr.bf16.mxu1 %v3279_v3  ;;  %v3313_v3 = vld [vmem:[#allocation13 + $0x80] ss:$16 sps:$4 sm:$0xff]  }
 0x2e0   : > { %1876 = vmatpush1.bf16.msra.mxu1 %v3277_v4 }
 0x2e1   : > { %1877 = vmatprep.subr.bf16.mxu1 %v3282_v5  ;;  %v3321_v5 = vld [vmem:[#allocation13 + $0xa4] ss:$16 sps:$4 sm:$0xff]  }
 0x2e4   : > { %1878 = vmatpush1.bf16.msra.mxu1 %v3280_v6 }
 0x2e5   : > { %1879 = vmatprep.subr.bf16.mxu1 %v3285_v8  ;;  %v3319_v8 = vld [vmem:[#allocation13 + $0xa0] ss:$16 sps:$4 sm:$0xff]  }
 0x2e8   : > { %1880 = vmatpush1.bf16.msra.mxu1 %v3283_v14 }
 0x2e9   : > { %1881 = vmatprep.subr.bf16.mxu1 %v3288_v16 }
 0x2ec   : > { %1882 = vmatpush1.bf16.msra.mxu1 %v3286_v17 }
 0x2ed   : > { %2332 = vmatprep.subr.bf16.mxu1 %v3291_v18  ;;  %v3345_v18 = vld [vmem:[#allocation13 + $0x124] ss:$16 sps:$4 sm:$0xff]  }
 0x352   : > { %v2917_v7 = vpop.f32.mrb[0].mxu1 }
 0x353   : > { %v2918_v10 = vpop.f32.mrb[1].mxu1 }
 0x354   : > { %v2919_v11 = vadd.f32 %v2918_v10, %v2917_v7  ;;  %v2920_v12 = vpop.f32.mrb[2].mxu1  ;;  %v3325_v10 = vld [vmem:[#allocation13 + $0xc0] ss:$16 sps:$4 sm:$0xff]  }
 0x355   : > { %v2921_v13 = vpop.f32.mrb[3].mxu1  ;;  %v3331_v12 = vld [vmem:[#allocation13 + $0xe0] ss:$16 sps:$4 sm:$0xff]  }
 0x356   : > { %v4139_v15 = vadd.f32 %v2919_v11, %v2754_v9  ;;  %v3327_v9 = vld [vmem:[#allocation13 + $0xc4] ss:$16 sps:$4 sm:$0xff]  }
 0x357   : > { %v3333_v11 = vld [vmem:[#allocation13 + $0xe4] ss:$16 sps:$4 sm:$0xff]  }
 0x358   : > { %1425 = vrot.lane.b32.xlu1 %v4139_v15, %s3727_s17  ;;  %1424 = vst [vmem:[%s4144_s11] sm:$0xff] %v4139_v15  ;;  %v3339_v13 = vld [vmem:[#allocation13 + $0x104] ss:$16 sps:$4 sm:$0xff]  }
 0x392   : > { %v1739_v2 = vpop.f32.mrb[4].mxu1 }
 0x393   : > { %v1741_v4 = vpop.f32.mrb[5].mxu1 }
 0x394   : > { %v1743_v6 = vpop.f32.mrb[6].mxu1 }
 0x395   : > { %v1744_v7 = vpop.f32.mrb[7].mxu1 }
 0x3a2   : > { %v1780_v14 = vpop.f32.mrb[8].mxu1 }
 0x3a3   : > { %v1781_v16 = vadd.f32 %v1780_v14, %v1739_v2  ;;  %v1782_v17 = vpop.f32.mrb[9].mxu1 }
 0x3a4   : > { %v1783_v19 = vadd.f32 %v1782_v17, %v1741_v4  ;;  %v1784_v20 = vpop.f32.mrb[10].mxu1 }
 0x3a5   : > { %v1785_v21 = vpop.f32.mrb[11].mxu1 }
 0x3ca   : > { %v1426_v48 = vpop.permute.xlu1 %1425 }
 0x3cb   : > { %v1428_v49 = vmul.f32 0.5, %v1426_v48 }
 0x3cd   : > { %v1429_v50 = vmul.f32 1.442695, %v1428_v49 }
 0x3cf   : > { %3385 = vpow2.f32 %v1429_v50 }
 0x3d9   : > { %v3386_v52 = vpop.eup %3385 }
 0x3da   : > { %v1431_v53 = vmul.f32 %v3386_v52, %v1427_v51 }
 0x3dc   : > { %v1432_v54 = vadd.f32 %v1431_v53, %v4139_v15  ;;  %v3337_v15 = vld [vmem:[#allocation13 + $0x100] ss:$16 sps:$4 sm:$0xff]  }
 0x3de   : > { %v1433_v56 = vpack.c.bf16 %v1432_v54, %v1432_v54 }
 0x3e0   : > { %1900 = vmatmul.mubr.bf16.vlgmr.msra.gmra.mrb[12].mxu1 %v1433_v56 }
 0x3e1   : > { %2333 = vmatpush1.bf16.msra.mxu1 %v3289_v55 }
 0x3e2   : > { %2334 = vmatprep.subr.bf16.mxu1 %v3297_v59 }
 0x3e5   : > { %2335 = vmatpush1.bf16.msra.mxu1 %v3295_v61 }
 0x3e6   : > { %2336 = vmatprep.subr.bf16.mxu1 %v3303_v62 }
 0x3e9   : > { %2337 = vmatpush1.bf16.msra.mxu1 %v3301_v43 }
 0x3ea   : > { %2338 = vmatprep.subr.bf16.mxu1 %v3309_v63 }
 0x3ed   : > { %2339 = vmatpush1.bf16.msra.mxu1 %v3307_v0 }
 0x3ee   : > { %2340 = vmatprep.subr.bf16.mxu1 %v3315_v1 }
 0x3f1   : > { %2341 = vmatpush1.bf16.msra.mxu1 %v3313_v3 }
 0x3f2   : > { %2342 = vmatprep.subr.bf16.mxu1 %v3321_v5 }
 0x3f5   : > { %2343 = vmatpush1.bf16.msra.mxu1 %v3319_v8 }
 0x3f6   : > { %2344 = vmatprep.subr.bf16.mxu1 %v3327_v9 }
 0x3f9   : > { %2345 = vmatpush1.bf16.msra.mxu1 %v3325_v10 }
 0x3fa   : > { %2346 = vmatprep.subr.bf16.mxu1 %v3333_v11 }
 0x3fd   : > { %2347 = vmatpush1.bf16.msra.mxu1 %v3331_v12 }
 0x3fe   : > { %2348 = vmatprep.subr.bf16.mxu1 %v3339_v13 }
 0x401   : > { %2349 = vmatpush1.bf16.msra.mxu1 %v3337_v15 }
 0x402   : > { %2350 = vmatprep.subr.bf16.mxu1 %v3345_v18 }
 0x405   : > { %2351 = vmatpush1.bf16.msra.mxu1 %v3343_v22 }
 0x406   : > { %2352 = vmatprep.subr.bf16.mxu1 %v3351_v23 }
 0x409   : > { %2353 = vmatpush1.bf16.msra.mxu1 %v3349_v24 }
 0x40a   : > { %2354 = vmatprep.subr.bf16.mxu1 %v3357_v25 }
 0x40d   : > { %2355 = vmatpush1.bf16.msra.mxu1 %v3355_v26 }
 0x40e   : > { %2356 = vmatprep.subr.bf16.mxu1 %v3363_v27 }
 0x411   : > { %2357 = vmatpush1.bf16.msra.mxu1 %v3361_v28 }
 0x412   : > { %2358 = vmatprep.subr.bf16.mxu1 %v3369_v29 }
 0x415   : > { %2359 = vmatpush1.bf16.msra.mxu1 %v3367_v30 }
 0x416   : > { %2360 = vmatprep.subr.bf16.mxu1 %v3375_v31 }
 0x419   : > { %2361 = vmatpush1.bf16.msra.mxu1 %v3373_v33 }
 0x41a   : > { %2362 = vmatprep.subr.bf16.mxu1 %v3381_v35 }
 0x41d   : > { %2363 = vmatpush1.bf16.msra.mxu1 %v3379_v37 }
 0x4b3   : > { %v1901_v41 = vpop.f32.mrb[12].mxu1 }
 0x4b4   : > { %v1902_v44 = vadd.f32 %v1901_v41, %v1781_v16  ;;  %v1903_v45 = vpop.f32.mrb[13].mxu1 }
 0x4b5   : > { %v1904_v46 = vadd.f32 %v1903_v45, %v1783_v19  ;;  %v1905_v47 = vpop.f32.mrb[14].mxu1 }
 0x4b6   : > { %v1920_v48 = vadd.f32 %v1913_v40, %v1902_v44  ;;  %v1906_v49 = vpop.f32.mrb[15].mxu1 }
 0x4b7   : > { %v1921_v50 = vadd.f32 %v1917_v42, %v1904_v46 }
 0x4b8   : > { %v1922_v51 = vmax.f32 %v1920_v48, 0.0 }
 0x4b9   : > { %v1923_v52 = vmax.f32 %v1921_v50, 0.0 }
 0x4ba   : > { %v1924_v54 = vpack.c.bf16 %v1922_v51, %v1922_v51 }
 0x4bb   : > { %v1925_v53 = vpack.c.bf16 %v1923_v52, %v1923_v52 }
 0x4bd   : > { %2364 = vmatprep.mubr.bf16.mxu1 %v1925_v53  ;;  %2405 = vmatprep.mubr.bf16.mxu0 %v1925_v53 }
 0x4be   : > { %2365 = vmatmul.mubr.bf16.vlgmr.msra.gmra.mrb[16].mxu1 %v1924_v54  ;;  %2406 = vmatmul.mubr.bf16.vlgmr.msra.gmra.mrb[4].mxu0 %v1924_v54 }
 0x4bf   : > { %3608 = shalt.err (!%p3605_p2)
}
 0x4c0   : > { %s3609_s17 = scalar_lea.hbm %s4160_s12, 128  ;;  %s3613_s16 = scalar_lea.hbm %s4288_s26, 256 }
 0x4c1   : > { %p3610_p4 = scmp.ne.s32.totalorder %s4160_s12, %s3609_s17  ;;  %p3614_p10 = scmp.lt.u32.totalorder %s4160_s12, %s4288_s26 }
 0x4c2   : > { %p3615_p1 = scmp.lt.u32.totalorder %s3613_s16, %s3609_s17  ;;  %p3617_p12 = scmp.lt.u32.totalorder %s3609_s17, %s4160_s12 }
 0x4c3   : > { %p3611_p8 = pnand %p3610_p4, %p4289_p13 }
 0x4c4   : > { %p3616_p11 = por %p3615_p1, %p3614_p10 }
 0x4c5   : > { %p3612_p7 = pneg %p3611_p8 }
 0x4c6   : > { %p3618_p6 = por %p3617_p12, %p3616_p11 }
 0x4c8   : > { %p3619_p9 = pnand %p3618_p6, %p3612_p7 }
 0x4ca   : > { %3622 = shalt.err (!%p3619_p9)
}
 0x4cb   : > { %2960 = dma.vmem_to_hbm [thread:$0]  (%p4289_p13), %s2454_s30, 128, %s4160_s12, %s2435_s20   ;;  %v2002_v55 = vsub.s32 2, %v4111_v57  ;;  %v2006_v59 = vsub.s32 3, %v4111_v57 }
 0x4cc   : > { %s4290_s18 = sld [smem:[#allocation29_spill]]  ;;  %s2658_s30 = sshll.u32 %s4061_s6, 5 }
 0x4cd   : > { %s2900_s12 = sshll.u32 %s3816_s27, 9  ;;  %s549_s20 = scalar_lea.vmem [#allocation15], %s2658_s30 }
 0x4ce   : > { %s2467_s15 = sshll.u32 %s549_s20, 4  ;;  %s4291_s17 = sld [smem:[#allocation31_spill]]  ;;  %s4194_s15 = int_to_ptr.vmem [resolvable:$true] %s2467_s15 }
 0x4cf   : > { %s2440_s27 = scalar_lea.sflag [#allocation16], %s4061_s6  ;;  %s3623_s25 = scalar_lea.vmem %s4194_s15, 512 }
 0x4d0   : > { %p3624_p0 = scmp.ne.s32.totalorder %s4194_s15, %s3623_s25  ;;  %s3729_s16 = smov [#allocation15]  }
 0x4d1   : > { %s3627_s4 = sshll.u32 %s3729_s16, 4  ;;  %s3628_s4 = int_to_ptr.vmem [resolvable:$false] %s3627_s4 }
 0x4d2   : > { %v1990_v56 = vld [vmem:[%s4290_s18] sm:$0xf]  ;;  %p3625_p5 = pnand %p3624_p0, %p4289_p13  ;;  %s3629_s29 = scalar_lea.vmem %s3628_s4, 1024 }
 0x4d3   : > { %v1995_v61 = vrot.slane %v1990_v56, %v4114_v58  ;;  %v2003_v62 = vrot.slane %v1990_v56, %v2002_v55  ;;  %v1999_v43 = vrot.slane %v1990_v56, %v4120_v60  ;;  %v2007_v63 = vrot.slane %v1990_v56, %v2006_v59  ;;  %p3630_p2 = scmp.lt.s32.totalorder %s4194_s15, %s3628_s4  ;;  %p3631_p4 = scmp.lt.s32.totalorder %s3629_s29, %s3623_s25 }
 0x4d4   : > { %s4192_s11 = scalar_lea.hbm %s4291_s17, %s2900_s12  ;;  %p3626_p3 = pneg %p3625_p5 }
 0x4d5   : > { %p3632_p8 = por %p3631_p4, %p3630_p2 }
 0x4d7   : > { %p3633_p7 = pnand %p3632_p8, %p3626_p3 }
 0x591   : > { %v2366_v0 = vpop.f32.mrb[16].mxu1  ;;  %v2407_v1 = vpop.f32.mrb[4].mxu0 }
 0x592   : > { %v2367_v2 = vadd.f32 %v2366_v0, %v1995_v61  ;;  %v2408_v3 = vadd.f32 %v2407_v1, %v2003_v62  ;;  %v2368_v4 = vpop.f32.mrb[17].mxu1  ;;  %v2409_v5 = vpop.f32.mrb[5].mxu0 }
 0x593   : > { %v2369_v6 = vadd.f32 %v2368_v4, %v1999_v43  ;;  %v2410_v7 = vadd.f32 %v2409_v5, %v2007_v63  ;;  %v2370_v8 = vpop.f32.mrb[18].mxu1  ;;  %v2411_v9 = vpop.f32.mrb[6].mxu0 }
 0x594   : > { %v2414_v10 = vmul.f32 0.5, %v2367_v2  ;;  %v2416_v11 = vmul.f32 0.5, %v2408_v3  ;;  %v2371_v57 = vpop.f32.mrb[19].mxu1  ;;  %v2412_v12 = vpop.f32.mrb[7].mxu0 }
 0x595   : > { %v2415_v58 = vmul.f32 0.5, %v2369_v6  ;;  %v2417_v13 = vmul.f32 0.5, %v2410_v7 }
 0x596   : > { %3387 = vtanh.f32 %v2414_v10 }
 0x597   : > { %3389 = vtanh.f32 %v2416_v11 }
 0x598   : > { %3391 = vtanh.f32 %v2415_v58 }
 0x599   : > { %3393 = vtanh.f32 %v2417_v13 }
 0x5a0   : > { %v3388_v60 = vpop.eup %3387 }
 0x5a1   : > { %v3390_v14 = vpop.eup %3389  ;;  %v2422_v15 = vadd.f32 1.0, %v3388_v60 }
 0x5a2   : > { %v3392_v16 = vpop.eup %3391  ;;  %v2424_v17 = vadd.f32 1.0, %v3390_v14 }
 0x5a3   : > { %v3394_v18 = vpop.eup %3393  ;;  %v2426_v19 = vmul.f32 0.5, %v2422_v15  ;;  %v2423_v20 = vadd.f32 1.0, %v3392_v16 }
 0x5a4   : > { %v2428_v21 = vmul.f32 0.5, %v2424_v17  ;;  %v2425_v22 = vadd.f32 1.0, %v3394_v18 }
 0x5a5   : > { %2430 = vst [vmem:[%s549_s20] sm:$0xff] %v2426_v19  ;;  %v2427_v23 = vmul.f32 0.5, %v2423_v20 }
 0x5a6   : > { %2432 = vst [vmem:[%s549_s20 + $0x10] sm:$0xff] %v2428_v21  ;;  %v2429_v24 = vmul.f32 0.5, %v2425_v22 }
 0x5a7   : > { %2431 = vst [vmem:[%s549_s20 + $0x8] sm:$0xff] %v2427_v23 }
 0x5a8   : > { %2433 = vst [vmem:[%s549_s20 + $0x18] sm:$0xff] %v2429_v24 }
 0x5a9   : > { %3636 = shalt.err (!%p3633_p7)
}
 0x5aa   : > { %s3637_s6 = scalar_lea.hbm %s4192_s11, 512  ;;  %s3641_s18 = scalar_lea.hbm %s4291_s17, 1024 }
 0x5ab   : > { %p3638_p10 = scmp.ne.s32.totalorder %s4192_s11, %s3637_s6  ;;  %p3642_p12 = scmp.lt.u32.totalorder %s4192_s11, %s4291_s17 }
 0x5ac   : > { %p3643_p6 = scmp.lt.u32.totalorder %s3641_s18, %s3637_s6  ;;  %p3645_p0 = scmp.lt.u32.totalorder %s3637_s6, %s4192_s11 }
 0x5ad   : > { %p3639_p1 = pnand %p3638_p10, %p4289_p13 }
 0x5ae   : > { %p3644_p9 = por %p3643_p6, %p3642_p12 }
 0x5af   : > { %p3640_p11 = pneg %p3639_p1 }
 0x5b0   : > { %p3646_p5 = por %p3645_p0, %p3644_p9 }
 0x5b2   : > { %p3647_p3 = pnand %p3646_p5, %p3640_p11 }
 0x5b4   : > { %3650 = shalt.err (!%p3647_p3)
}
 0x5b5   : > { %2961 = dma.vmem_to_hbm [thread:$0]  (%p4289_p13), %s4194_s15, 512, %s4192_s11, %s2440_s27  }
 0x5b6 PF: > { %s2479_s20 = sand.u32 1, %s3697_s21   ;;  %p4292_p2 = scmp.ne.s32.totalorder %s4275_s14, 0 }
 0x5b7   : > { %p4293_p4 = scmp.ge.s32.totalorder %s3709_s24, 2  ;;  %s2480_s10 = scalar_lea.sflag [#allocation4], %s2479_s20 }
 0x5b9   : > { %p2988_p8 = pnand %p4293_p4, %p4292_p2 }
 0x5bb   : > { %3688 = dma.done.wait (!%p2988_p8), %s2480_s10, 128  }
 0x5bc   : > { %3690 = vsyncadd (!%p2988_p8), %s2480_s10, 4294967168  ;;  %s2489_s8 = scalar_lea.sflag [#allocation16], %s2479_s20 }
 0x5bd   : > { %3692 = dma.done.wait (!%p2988_p8), %s2489_s8, 512  }
 0x5be   : > { %3694 = vsyncadd (!%p2988_p8), %s2489_s8, 4294966784  ;;  %p34_p13 = scmp.ge.s32.totalorder %s3958_s2, 4   ;;  %s4294_s21 = smov %s3701_s22 }
 0x5bf   : > { %s4295_s22 = smov %s3705_s23  ;;  %s4296_s23 = smov %s3970_s13 }
 0x5c0   : > { %s4297_s24 = smov %s3958_s2  ;;  %36 = sbr.rel (!%p34_p13) target bundleno = 20 (0x14), region = 159 }
 0x5c7   :  { %2494 = vsyncpa [#allocation3], 1 }
 0x5c8   :  { %2496 = vsyncpa [#allocation3 + $0x1], 1 }
 0x5c9   :  { %2497 = vsyncpa [#allocation6], 1 }
 0x5ca   :  { %2499 = vsyncpa [#allocation6 + $0x1], 1 }
 0x5cb   :  { %2500 = vsyncpa [#allocation9], 1 }
 0x5cc   :  { %2501 = vsyncpa [#allocation12], 1 }
 0x5cd   :  { %2502 = vsyncpa [#allocation4], 1 }
 0x5ce   :  { %2504 = vsyncpa [#allocation4 + $0x1], 1 }
 0x5cf   :  { %2505 = vsyncpa [#allocation16], 1 }
 0x5d0   :  { %2507 = vsyncpa [#allocation16 + $0x1], 1 }

</bundles_post_ra>
